<compile_context>
chip_gen: v7x
topology: tpu7x:2x2x1
jax: 0.10.0
libtpu: 0.0.40
codegen_flags: <defaults>
</compile_context>

<pallas_src>
import jax
import jax.numpy as jnp
from jax.experimental import pallas as pl
from jax.experimental.pallas import tpu as pltpu


# ----------------------------------------------------------------------------
# helpers
# ----------------------------------------------------------------------------
def _round_up(x, m):
    return ((x + m - 1) // m) * m


def _pick_tm(n_rows, tm_max=8192, tm_min=1024, min_grid=16):
    """Row tile: large enough to amortize the ~0.35us grid-step overhead, but
    keep >= min_grid tiles for big inputs (v7x 2-TC sharding); multiple of 16
    for clean bf16 sublane packing; never larger than the (rounded) problem."""
    tm = max(tm_min, -(-n_rows // min_grid))
    tm = min(tm, tm_max)
    tm = min(tm, _round_up(n_rows, 16))
    return max(16, _round_up(tm, 16))


# ----------------------------------------------------------------------------
# Pallas kernel: fused encoder MLP + residual backbone + fused branch heads
# ----------------------------------------------------------------------------
def _unet_wrapper_kernel(
    xyz_ref,            # [tm, 3]  f32 point positions
    nrm_ref,            # [tm, 3]  f32 point normals
    w0_ref,             # [8, C]   f32 encoder input weight (6 real + 2 zero rows)
    wstk_ref,           # [3, C, C] f32 : w1 | wb1 | wb2
    bstk_ref,           # [4, C]   f32 : b0 | b1 | bb1 | bb2
    wh_ref,             # [C, 48]  f32 fused heads: dist(32)|struct(2)|nrm(3)|sem(4)|col(3)|pad(4)
    bh_ref,             # [1, 48]  f32
    dist_ref,           # [tm, 32] bf16 output: dist_features
    small_ref,          # [tm, 16] bf16 output: packed narrow heads
):
    # Encoder input: concat xyz|normal and pad to 8 lanes (matches w0's 8 rows)
    xyz = xyz_ref[...]
    nrm = nrm_ref[...]
    zpad = jnp.zeros((xyz.shape[0], 2), jnp.float32)
    x = jnp.concatenate([xyz, nrm, zpad], axis=-1)            # [tm, 8] f32

    # Encoder: Linear -> ReLU -> Linear -> ReLU (per-voxel MLP), f32 chain
    h = jnp.dot(x, w0_ref[...], preferred_element_type=jnp.float32) + bstk_ref[0:1, :]
    h = jnp.maximum(h, 0.0)
    h = jnp.dot(h, wstk_ref[0], preferred_element_type=jnp.float32) + bstk_ref[1:2, :]
    h = jnp.maximum(h, 0.0)

    # UNet backbone stand-in (StructPredictionNet): residual MLP block
    # TODO(synk): the real StructPredictionNet is a sparse-conv UNet over the
    # fvdb hash tree (down/up-sampling, attention); no Pallas equivalent.
    r = jnp.dot(h, wstk_ref[1], preferred_element_type=jnp.float32) + bstk_ref[2:3, :]
    r = jnp.maximum(r, 0.0)
    h2 = h + jnp.dot(r, wstk_ref[2], preferred_element_type=jnp.float32) + bstk_ref[3:4, :]

    # All five branch heads in ONE [C, 48] matmul, split into two stores.
    heads = jnp.dot(h2, wh_ref[...], preferred_element_type=jnp.float32) + bh_ref[...]
    dw = dist_ref.shape[-1]
    sw = small_ref.shape[-1]
    dist_ref[...] = heads[:, 0:dw].astype(dist_ref.dtype)
    small_ref[...] = heads[:, dw:dw + sw].astype(small_ref.dtype)


def unet_wrapper_pallas(xyz, normals, prepared, *, tm_max=8192):
    """xyz/normals: [N, 3] f32. Returns (dist [N, C] bf16, packed_small [N, 16] bf16)."""
    n = xyz.shape[0]
    c_dim = prepared["wh"].shape[0]
    h_tot = prepared["wh"].shape[1]
    n_small = h_tot - c_dim

    tm = _pick_tm(n, tm_max=tm_max)
    grid = (-(-n // tm),)                     # ragged last block is masked by Pallas

    weight_order = ["w0", "wstack", "bstack", "wh", "bh"]
    weight_args = [prepared[k] for k in weight_order]
    weight_specs = [
        pl.BlockSpec(prepared["w0"].shape, lambda i: (0, 0)),
        pl.BlockSpec(prepared["wstack"].shape, lambda i: (0, 0, 0)),
        pl.BlockSpec(prepared["bstack"].shape, lambda i: (0, 0)),
        pl.BlockSpec(prepared["wh"].shape, lambda i: (0, 0)),
        pl.BlockSpec(prepared["bh"].shape, lambda i: (0, 0)),
    ]

    flops = 2 * n * (8 * c_dim + 3 * c_dim * c_dim + c_dim * h_tot)
    bytes_accessed = (
        n * 6 * 4                                   # f32 xyz + normal read
        + n * h_tot * 2                             # bf16 outputs (dist + packed)
        + sum(int(v.size) * v.dtype.itemsize for v in weight_args)
    )

    dist, small = pl.pallas_call(
        _unet_wrapper_kernel,
        out_shape=(
            jax.ShapeDtypeStruct((n, c_dim), jnp.bfloat16),
            jax.ShapeDtypeStruct((n, n_small), jnp.bfloat16),
        ),
        grid=grid,
        in_specs=[
            pl.BlockSpec((tm, 3), lambda i: (i, 0)),
            pl.BlockSpec((tm, 3), lambda i: (i, 0)),
        ] + weight_specs,
        out_specs=(
            pl.BlockSpec((tm, c_dim), lambda i: (i, 0)),
            pl.BlockSpec((tm, n_small), lambda i: (i, 0)),
        ),
        compiler_params=pltpu.CompilerParams(
            dimension_semantics=("parallel",),
            vmem_limit_bytes=32 * 1024 * 1024,
        ),
        cost_estimate=pl.CostEstimate(
            flops=flops, transcendentals=0, bytes_accessed=bytes_accessed),
    )(xyz, normals, *weight_args)
    return dist, small


# ----------------------------------------------------------------------------
# Params
# ----------------------------------------------------------------------------
def init_params(key, c_in, c_dim, n_struct, n_sem):
    def lin(k, fan_in, fan_out):
        kw, _ = jax.random.split(k)
        scale = 1.0 / jnp.sqrt(jnp.float32(fan_in))
        w = jax.random.uniform(kw, (fan_in, fan_out), jnp.float32, -scale, scale)
        b = jnp.zeros((1, fan_out), jnp.float32)
        return w, b

    keys = jax.random.split(key, 9)
    p = {}
    p["w0"], p["b0"] = lin(keys[0], c_in, c_dim)
    p["w1"], p["b1"] = lin(keys[1], c_dim, c_dim)
    p["wb1"], p["bb1"] = lin(keys[2], c_dim, c_dim)
    p["wb2"], p["bb2"] = lin(keys[3], c_dim, c_dim)
    p["ws"], p["bs"] = lin(keys[4], c_dim, n_struct)   # structure logits
    p["wd"], p["bd"] = lin(keys[5], c_dim, c_dim)      # dist features
    p["wn"], p["bn"] = lin(keys[6], c_dim, 3)          # normal branch
    p["wm"], p["bm"] = lin(keys[7], c_dim, n_sem)      # semantic branch
    p["wc"], p["bc"] = lin(keys[8], c_dim, 3)          # color branch
    return p


def prepare_params(params, *, c_in_pad=8):
    """Fuse the 5 heads into one [C, 48] weight (dist | struct | normal |
    semantic | color | pad), stack the hidden weights/biases, pad the encoder
    input weight to 8 rows.  All f32 (tiny, HBM read is negligible)."""
    c_dim = params["w1"].shape[0]
    w0 = jnp.pad(params["w0"], ((0, c_in_pad - params["w0"].shape[0]), (0, 0)))

    wh = jnp.concatenate(
        [params["wd"], params["ws"], params["wn"], params["wm"], params["wc"]],
        axis=1)
    bh = jnp.concatenate(
        [params["bd"], params["bs"], params["bn"], params["bm"], params["bc"]],
        axis=1)
    n_heads = wh.shape[1]
    small_pad = _round_up(n_heads - c_dim, 8)          # packed narrow-head width
    h_pad = c_dim + small_pad
    wh = jnp.pad(wh, ((0, 0), (0, h_pad - n_heads)))
    bh = jnp.pad(bh, ((0, 0), (0, h_pad - n_heads)))

    wstack = jnp.stack([params["w1"], params["wb1"], params["wb2"]], axis=0)
    bstack = jnp.concatenate(
        [params["b0"], params["b1"], params["bb1"], params["bb2"]], axis=0)

    return {
        "w0": w0.astype(jnp.float32),
        "wstack": wstack.astype(jnp.float32),
        "bstack": bstack.astype(jnp.float32),
        "wh": wh.astype(jnp.float32),
        "bh": bh.astype(jnp.float32),
    }


# ----------------------------------------------------------------------------
# Forward glue: hash tree (plain JAX) + fused kernel + head slicing inside jit
# ----------------------------------------------------------------------------
def make_unet_wrapper_forward(prepared, hparams, head_dims):
    tree_depth = int(hparams["tree_depth"])
    use_hash_tree = bool(hparams["use_hash_tree"])
    voxel_size = tuple(float(v) for v in hparams["voxel_size"])
    n_struct, c_dim, n_sem = head_dims

    @jax.jit
    def _compute(xyz, normals):
        # TODO(synk): fvdb.gridbatch_from_nearest_voxels_to_points (sparse grid
        # dedup / hashing) has no Pallas equivalent; we return per-point
        # coarsened integer voxel coordinates per tree depth instead.
        vs = jnp.asarray(voxel_size, jnp.float32)
        ijk0 = jnp.floor(xyz / vs).astype(jnp.int32)
        hash_tree = {}
        for depth in range(tree_depth):
            if depth != 0 and not use_hash_tree:
                break
            hash_tree[depth] = ijk0 // (2 ** depth)

        dist_f, small = unet_wrapper_pallas(xyz, normals, prepared)
        # Narrow heads are packed in `small`; slices fuse with the pallas_call
        # outputs because they live inside the same jit.
        o = 0
        struct_f = small[:, o:o + n_struct]; o += n_struct
        normal_f = small[:, o:o + 3]; o += 3
        sem_f = small[:, o:o + n_sem]; o += n_sem
        color_f = small[:, o:o + 3]
        return hash_tree, struct_f, dist_f, normal_f, sem_f, color_f

    def forward(batch, out):
        xyz = batch["input_pc"]
        normals = batch["input_normal"]
        hash_tree, struct_f, dist_f, normal_f, sem_f, color_f = _compute(xyz, normals)
        input_grid = hash_tree[0]
        batch.update({"input_grid": input_grid})
        tree = hash_tree if use_hash_tree else None

        out = dict(out)
        out.update({"tree": tree})
        out.update({"structure_features": struct_f, "dist_features": dist_f})
        out.update({"gt_grid": input_grid})
        out.update({"gt_tree": tree})
        if hparams["with_normal_branch"]:
            out.update({"normal_features": normal_f})
        if hparams["with_semantic_branch"]:
            out.update({"semantic_features": sem_f})
        if hparams["with_color_branch"]:
            out.update({"color_features": color_f})
        return out

    return forward


# Pure-JAX f32 reference for the fused per-voxel compute path
def _reference(xyz, normals, prepared):
    zpad = jnp.zeros((xyz.shape[0], 2), jnp.float32)
    x = jnp.concatenate([xyz, normals, zpad], axis=-1).astype(jnp.float32)
    h = jnp.maximum(x @ prepared["w0"] + prepared["bstack"][0:1], 0.0)
    h = jnp.maximum(h @ prepared["wstack"][0] + prepared["bstack"][1:2], 0.0)
    r = jnp.maximum(h @ prepared["wstack"][1] + prepared["bstack"][2:3], 0.0)
    h2 = h + r @ prepared["wstack"][2] + prepared["bstack"][3:4]
    return h2 @ prepared["wh"] + prepared["bh"]        # [N, 48] f32


if __name__ == "__main__":
    hparams = {
        "tree_depth": 3,
        "voxel_size": [0.1, 0.1, 0.1],
        "use_hash_tree": True,
        "use_input_normal": True,
        "use_input_semantic": False,
        "use_input_color": False,
        "use_input_intensity": False,
        "c_dim": 32,
        "with_normal_branch": True,
        "with_semantic_branch": True,
        "with_color_branch": True,
        "cut_ratio": 1.0,
    }

    N = 250          # arbitrary voxel count (deliberately not a tile multiple)
    C_IN = 6         # xyz + normal
    C_DIM = hparams["c_dim"]
    N_STRUCT = 2     # structure logits (empty / occupied)
    N_SEM = 4        # semantic classes

    key = jax.random.PRNGKey(0)
    k_xyz, k_nrm, k_par = jax.random.split(key, 3)
    xyz = jax.random.uniform(k_xyz, (N, 3), jnp.float32, -1.0, 1.0)
    normals = jax.random.normal(k_nrm, (N, 3), jnp.float32)
    normals = normals / jnp.linalg.norm(normals, axis=-1, keepdims=True)

    params = init_params(k_par, C_IN, C_DIM, N_STRUCT, N_SEM)
    prepared = prepare_params(params, c_in_pad=8)

    forward = make_unet_wrapper_forward(prepared, hparams,
                                        head_dims=(N_STRUCT, C_DIM, N_SEM))
    batch = {"input_pc": xyz, "input_normal": normals}
    out = forward(batch, {})
    jax.block_until_ready(out["structure_features"])

    # correctness check against pure-JAX f32 reference (outputs are bf16)
    heads_ref = _reference(xyz, normals, prepared)
    c = C_DIM
    ref_map = {
        "dist_features": heads_ref[:, 0:c],
        "structure_features": heads_ref[:, c:c + N_STRUCT],
        "normal_features": heads_ref[:, c + N_STRUCT:c + N_STRUCT + 3],
        "semantic_features": heads_ref[:, c + N_STRUCT + 3:c + N_STRUCT + 3 + N_SEM],
        "color_features": heads_ref[:, c + N_STRUCT + 3 + N_SEM:
                                    c + N_STRUCT + 3 + N_SEM + 3],
    }
    for name, ref in ref_map.items():
        got = out[name].astype(jnp.float32)
        assert got.shape == ref.shape, (name, got.shape, ref.shape)
        assert jnp.allclose(got, ref, atol=2e-2, rtol=2e-2), name

    print("KERNEL_OK")
</pallas_src>

<mosaic_0001>
module attributes {stable_mosaic.version = 11 : i64} {
  func.func @_unet_wrapper_kernel(%arg0: i32, %arg1: memref<256x3xf32, #tpu.memory_space<vmem>>, %arg2: memref<256x3xf32, #tpu.memory_space<vmem>>, %arg3: memref<8x32xf32, #tpu.memory_space<vmem>>, %arg4: memref<3x32x32xf32, #tpu.memory_space<vmem>>, %arg5: memref<4x32xf32, #tpu.memory_space<vmem>>, %arg6: memref<32x48xf32, #tpu.memory_space<vmem>>, %arg7: memref<1x48xf32, #tpu.memory_space<vmem>>, %arg8: memref<256x32xbf16, #tpu.memory_space<vmem>>, %arg9: memref<256x16xbf16, #tpu.memory_space<vmem>>) attributes {dimension_semantics = [#tpu.dimension_semantics<parallel>], iteration_bounds = array<i64: 1>, scalar_prefetch = 0 : i64, scratch_operands = 0 : i64, tpu.core_type = #tpu.core_type<tc>, window_params = [{transform_indices = @transform_0, window_bounds = array<i64: 256, 3>}, {transform_indices = @transform_1, window_bounds = array<i64: 256, 3>}, {pipeline_mode = #tpu.pipeline_mode<synchronous>, transform_indices = @transform_2, window_bounds = array<i64: 8, 32>}, {pipeline_mode = #tpu.pipeline_mode<synchronous>, transform_indices = @transform_3, window_bounds = array<i64: 3, 32, 32>}, {pipeline_mode = #tpu.pipeline_mode<synchronous>, transform_indices = @transform_4, window_bounds = array<i64: 4, 32>}, {pipeline_mode = #tpu.pipeline_mode<synchronous>, transform_indices = @transform_5, window_bounds = array<i64: 32, 48>}, {pipeline_mode = #tpu.pipeline_mode<synchronous>, transform_indices = @transform_6, window_bounds = array<i64: 1, 48>}, {transform_indices = @transform_7, window_bounds = array<i64: 256, 32>}, {transform_indices = @transform_8, window_bounds = array<i64: 256, 16>}]} {
    %c0 = arith.constant 0 : index
    %c0_0 = arith.constant 0 : index
    %0 = vector.load %arg1[%c0, %c0_0] : memref<256x3xf32, #tpu.memory_space<vmem>>, vector<256x3xf32>
    %c0_1 = arith.constant 0 : index
    %c0_2 = arith.constant 0 : index
    %1 = vector.load %arg2[%c0_1, %c0_2] : memref<256x3xf32, #tpu.memory_space<vmem>>, vector<256x3xf32>
    %cst = arith.constant 0.000000e+00 : f32
    %2 = vector.broadcast %cst : f32 to vector<256x2xf32>
    %3 = tpu.concatenate %0, %1, %2 in 1 : vector<256x3xf32>, vector<256x3xf32>, vector<256x2xf32> -> vector<256x8xf32>
    %c0_3 = arith.constant 0 : index
    %c0_4 = arith.constant 0 : index
    %4 = vector.load %arg3[%c0_3, %c0_4] : memref<8x32xf32, #tpu.memory_space<vmem>>, vector<8x32xf32>
    %cst_5 = arith.constant dense<0.000000e+00> : vector<256x32xf32>
    %5 = tpu.matmul %3, %4, %cst_5 {dimension_numbers = #tpu.dot_dimension_numbers<[1], [0], [0], [1], [0, 0, 1, 1], [], []>} : vector<256x8xf32>, vector<8x32xf32>, vector<256x32xf32> -> vector<256x32xf32>
    %c0_6 = arith.constant 0 : index
    %c0_7 = arith.constant 0 : index
    %6 = vector.load %arg5[%c0_6, %c0_7] : memref<4x32xf32, #tpu.memory_space<vmem>>, vector<1x32xf32>
    %7 = vector.broadcast %6 : vector<1x32xf32> to vector<256x32xf32>
    %8 = arith.addf %5, %7 : vector<256x32xf32>
    %cst_8 = arith.constant 0.000000e+00 : f32
    %9 = vector.broadcast %cst_8 : f32 to vector<256x32xf32>
    %10 = arith.maximumf %8, %9 : vector<256x32xf32>
    %c0_9 = arith.constant 0 : index
    %c0_10 = arith.constant 0 : index
    %c0_11 = arith.constant 0 : index
    %11 = vector.load %arg4[%c0_9, %c0_10, %c0_11] : memref<3x32x32xf32, #tpu.memory_space<vmem>>, vector<1x32x32xf32>
    %12 = vector.shape_cast %11 : vector<1x32x32xf32> to vector<32x32xf32>
    %cst_12 = arith.constant dense<0.000000e+00> : vector<256x32xf32>
    %13 = tpu.matmul %10, %12, %cst_12 {dimension_numbers = #tpu.dot_dimension_numbers<[1], [0], [0], [1], [0, 0, 1, 1], [], []>} : vector<256x32xf32>, vector<32x32xf32>, vector<256x32xf32> -> vector<256x32xf32>
    %c1 = arith.constant 1 : index
    %c0_13 = arith.constant 0 : index
    %14 = vector.load %arg5[%c1, %c0_13] : memref<4x32xf32, #tpu.memory_space<vmem>>, vector<1x32xf32>
    %15 = vector.broadcast %14 : vector<1x32xf32> to vector<256x32xf32>
    %16 = arith.addf %13, %15 : vector<256x32xf32>
    %cst_14 = arith.constant 0.000000e+00 : f32
    %17 = vector.broadcast %cst_14 : f32 to vector<256x32xf32>
    %18 = arith.maximumf %16, %17 : vector<256x32xf32>
    %c1_15 = arith.constant 1 : index
    %c0_16 = arith.constant 0 : index
    %c0_17 = arith.constant 0 : index
    %19 = vector.load %arg4[%c1_15, %c0_16, %c0_17] : memref<3x32x32xf32, #tpu.memory_space<vmem>>, vector<1x32x32xf32>
    %20 = vector.shape_cast %19 : vector<1x32x32xf32> to vector<32x32xf32>
    %cst_18 = arith.constant dense<0.000000e+00> : vector<256x32xf32>
    %21 = tpu.matmul %18, %20, %cst_18 {dimension_numbers = #tpu.dot_dimension_numbers<[1], [0], [0], [1], [0, 0, 1, 1], [], []>} : vector<256x32xf32>, vector<32x32xf32>, vector<256x32xf32> -> vector<256x32xf32>
    %c2 = arith.constant 2 : index
    %c0_19 = arith.constant 0 : index
    %22 = vector.load %arg5[%c2, %c0_19] : memref<4x32xf32, #tpu.memory_space<vmem>>, vector<1x32xf32>
    %23 = vector.broadcast %22 : vector<1x32xf32> to vector<256x32xf32>
    %24 = arith.addf %21, %23 : vector<256x32xf32>
    %cst_20 = arith.constant 0.000000e+00 : f32
    %25 = vector.broadcast %cst_20 : f32 to vector<256x32xf32>
    %26 = arith.maximumf %24, %25 : vector<256x32xf32>
    %c2_21 = arith.constant 2 : index
    %c0_22 = arith.constant 0 : index
    %c0_23 = arith.constant 0 : index
    %27 = vector.load %arg4[%c2_21, %c0_22, %c0_23] : memref<3x32x32xf32, #tpu.memory_space<vmem>>, vector<1x32x32xf32>
    %28 = vector.shape_cast %27 : vector<1x32x32xf32> to vector<32x32xf32>
    %cst_24 = arith.constant dense<0.000000e+00> : vector<256x32xf32>
    %29 = tpu.matmul %26, %28, %cst_24 {dimension_numbers = #tpu.dot_dimension_numbers<[1], [0], [0], [1], [0, 0, 1, 1], [], []>} : vector<256x32xf32>, vector<32x32xf32>, vector<256x32xf32> -> vector<256x32xf32>
    %30 = arith.addf %18, %29 : vector<256x32xf32>
    %c3 = arith.constant 3 : index
    %c0_25 = arith.constant 0 : index
    %31 = vector.load %arg5[%c3, %c0_25] : memref<4x32xf32, #tpu.memory_space<vmem>>, vector<1x32xf32>
    %32 = vector.broadcast %31 : vector<1x32xf32> to vector<256x32xf32>
    %33 = arith.addf %30, %32 : vector<256x32xf32>
    %c0_26 = arith.constant 0 : index
    %c0_27 = arith.constant 0 : index
    %34 = vector.load %arg6[%c0_26, %c0_27] : memref<32x48xf32, #tpu.memory_space<vmem>>, vector<32x48xf32>
    %cst_28 = arith.constant dense<0.000000e+00> : vector<256x48xf32>
    %35 = tpu.matmul %33, %34, %cst_28 {dimension_numbers = #tpu.dot_dimension_numbers<[1], [0], [0], [1], [0, 0, 1, 1], [], []>} : vector<256x32xf32>, vector<32x48xf32>, vector<256x48xf32> -> vector<256x48xf32>
    %c0_29 = arith.constant 0 : index
    %c0_30 = arith.constant 0 : index
    %36 = vector.load %arg7[%c0_29, %c0_30] : memref<1x48xf32, #tpu.memory_space<vmem>>, vector<1x48xf32>
    %37 = vector.broadcast %36 : vector<1x48xf32> to vector<256x48xf32>
    %38 = arith.addf %35, %37 : vector<256x48xf32>
    %39 = vector.extract_strided_slice %38 {offsets = [0, 0], sizes = [256, 32], strides = [1, 1]} : vector<256x48xf32> to vector<256x32xf32>
    %40 = arith.truncf %39 : vector<256x32xf32> to vector<256x32xbf16>
    %c0_31 = arith.constant 0 : index
    %c0_32 = arith.constant 0 : index
    %41 = vector.load %arg8[%c0_31, %c0_32] : memref<256x32xbf16, #tpu.memory_space<vmem>>, vector<256x32xbf16>
    tpu.vector_store %arg8[%c0_31, %c0_32], %40 {strides = array<i32>} : memref<256x32xbf16, #tpu.memory_space<vmem>>, vector<256x32xbf16>,
    %42 = vector.extract_strided_slice %38 {offsets = [0, 32], sizes = [256, 16], strides = [1, 1]} : vector<256x48xf32> to vector<256x16xf32>
    %43 = arith.truncf %42 : vector<256x16xf32> to vector<256x16xbf16>
    %c0_33 = arith.constant 0 : index
    %c0_34 = arith.constant 0 : index
    %44 = vector.load %arg9[%c0_33, %c0_34] : memref<256x16xbf16, #tpu.memory_space<vmem>>, vector<256x16xbf16>
    tpu.vector_store %arg9[%c0_33, %c0_34], %43 {strides = array<i32>} : memref<256x16xbf16, #tpu.memory_space<vmem>>, vector<256x16xbf16>,
    return
  }
  func.func @transform_0(%arg0: i32) -> (i32, i32) {
    %c0_i32 = arith.constant 0 : i32
    %c0_i32_0 = arith.constant 0 : i32
    return %arg0, %c0_i32 : i32, i32
  }
  func.func @transform_1(%arg0: i32) -> (i32, i32) {
    %c0_i32 = arith.constant 0 : i32
    %c0_i32_0 = arith.constant 0 : i32
    return %arg0, %c0_i32 : i32, i32
  }
  func.func @transform_2(%arg0: i32) -> (i32, i32) {
    %c0_i32 = arith.constant 0 : i32
    %c0_i32_0 = arith.constant 0 : i32
    %c0_i32_1 = arith.constant 0 : i32
    return %c0_i32, %c0_i32_0 : i32, i32
  }
  func.func @transform_3(%arg0: i32) -> (i32, i32, i32) {
    %c0_i32 = arith.constant 0 : i32
    %c0_i32_0 = arith.constant 0 : i32
    %c0_i32_1 = arith.constant 0 : i32
    %c0_i32_2 = arith.constant 0 : i32
    return %c0_i32, %c0_i32_0, %c0_i32_1 : i32, i32, i32
  }
  func.func @transform_4(%arg0: i32) -> (i32, i32) {
    %c0_i32 = arith.constant 0 : i32
    %c0_i32_0 = arith.constant 0 : i32
    %c0_i32_1 = arith.constant 0 : i32
    return %c0_i32, %c0_i32_0 : i32, i32
  }
  func.func @transform_5(%arg0: i32) -> (i32, i32) {
    %c0_i32 = arith.constant 0 : i32
    %c0_i32_0 = arith.constant 0 : i32
    %c0_i32_1 = arith.constant 0 : i32
    return %c0_i32, %c0_i32_0 : i32, i32
  }
  func.func @transform_6(%arg0: i32) -> (i32, i32) {
    %c0_i32 = arith.constant 0 : i32
    %c0_i32_0 = arith.constant 0 : i32
    %c0_i32_1 = arith.constant 0 : i32
    return %c0_i32, %c0_i32_0 : i32, i32
  }
  func.func @transform_7(%arg0: i32) -> (i32, i32) {
    %c0_i32 = arith.constant 0 : i32
    %c0_i32_0 = arith.constant 0 : i32
    return %arg0, %c0_i32 : i32, i32
  }
  func.func @transform_8(%arg0: i32) -> (i32, i32) {
    %c0_i32 = arith.constant 0 : i32
    %c0_i32_0 = arith.constant 0 : i32
    return %arg0, %c0_i32 : i32, i32
  }
}

</mosaic_0001>

<bundles_post_ra>
// kernel: _compute.1
= control target key start
LH: loop header
LB: loop body
LE: loop exit
PB: predicated region body
PF: predicated region fallthrough
CT: control target
= control target key end

     0   :  { %s3121_s9 = smov 3   ;;  %vm220_vm0 = vcmask 23552   ;;  %vm253_vm1 = vcmask 48128   ;;  %vm292_vm2 = vcmask 64512   ;;  %vm655_vm3 = vcmask 261120   ;;  %s3122_s13 = smov 96   ;;  %s4368_s1 = inlined_call_operand.vmem [shape: f32[250,3], index: 1, kind: input, shape index: {}]   ;;  %s4369_s2 = inlined_call_operand.vmem [shape: f32[8,32], index: 2, kind: input, shape index: {}]   ;;  %s4370_s3 = inlined_call_operand.vmem [shape: f32[3,32,32], index: 3, kind: input, shape index: {}]   ;;  %s4371_s0 = inlined_call_operand.vmem [shape: f32[250,3], index: 0, kind: input, shape index: {}]   ;;  %s4372_s4 = inlined_call_operand.vmem [shape: f32[4,32], index: 4, kind: input, shape index: {}]   ;;  %s4373_s5 = inlined_call_operand.vmem [shape: f32[32,48], index: 5, kind: input, shape index: {}]   ;;  %s4374_s6 = inlined_call_operand.vmem [shape: f32[1,48], index: 6, kind: input, shape index: {}]   ;;  %s4375_s7 = inlined_call_operand.vmem [shape: bf16[250,32], index: 7, kind: output, shape index: {0}]   ;;  %s4376_s8 = inlined_call_operand.vmem [shape: bf16[250,16], index: 8, kind: output, shape index: {1}]  }
   0x1   :  { %v60_v0 = vld [vmem:[%s4368_s1] sm:$0xff]  ;;  %v62_v1 = vld [vmem:[%s4368_s1 + $0x10] sm:$0xff]  ;;  %v61_v2 = vld [vmem:[%s4368_s1 + $0x8] sm:$0xff]  ;;  %vm2227_vm4 = vcmask 257024   ;;  %vm2356_vm5 = vcmask 125952  }
   0x2   :  { %124 = vrot.lane.b32.xlu0 %v60_v0, %s3121_s9  ;;  %128 = vrot.lane.b32.xlu1 %v62_v1, %s3121_s9  ;;  %v63_v3 = vld [vmem:[%s4368_s1 + $0x18] sm:$0xff]  ;;  %v64_v4 = vld [vmem:[%s4368_s1 + $0x20] sm:$0xff] }
   0x3   :  { %v65_v5 = vld [vmem:[%s4368_s1 + $0x28] sm:$0xff]  ;;  %v66_v6 = vld [vmem:[%s4368_s1 + $0x30] sm:$0xff]  ;;  %v67_v7 = vld [vmem:[%s4368_s1 + $0x38] sm:$0xff] }
   0x4   :  { %v286_v8 = vld [vmem:[%s4369_s2] sm:$0xff]  ;;  %v69_v10 = vld [vmem:[%s4368_s1 + $0x48] sm:$0xff]  ;;  %v70_v11 = vld [vmem:[%s4368_s1 + $0x50] sm:$0xff] }
   0x5   :  { %v68_v9 = vld [vmem:[%s4368_s1 + $0x40] sm:$0xff]  ;;  %2811 = vmatprep.subr.mxu0 %v286_v8  ;;  %3117 = vmatprep.subr.mxu1 %v286_v8  ;;  %v71_v12 = vld [vmem:[%s4368_s1 + $0x58] sm:$0xff]  ;;  %v73_v14 = vld [vmem:[%s4368_s1 + $0x68] sm:$0xff] }
   0x6   :  { %126 = vrot.lane.b32.xlu0 %v61_v2, %s3121_s9  ;;  %130 = vrot.lane.b32.xlu1 %v63_v3, %s3121_s9  ;;  %v72_v13 = vld [vmem:[%s4368_s1 + $0x60] sm:$0xff]  ;;  %v74_v15 = vld [vmem:[%s4368_s1 + $0x70] sm:$0xff] }
   0x7   :  { %2812 = vmatpush3.msra.mxu0 %v286_v8  ;;  %3118 = vmatpush3.msra.mxu1 %v286_v8  ;;  %v75_v16 = vld [vmem:[%s4368_s1 + $0x78] sm:$0xff]  ;;  %v76_v17 = vld [vmem:[%s4368_s1 + $0x80] sm:$0xff]  ;;  %v77_v18 = vld [vmem:[%s4368_s1 + $0x88] sm:$0xff] }
   0x8   :  { %v78_v19 = vld [vmem:[%s4368_s1 + $0x90] sm:$0xff]  ;;  %v79_v20 = vld [vmem:[%s4368_s1 + $0x98] sm:$0xff]  ;;  %v80_v21 = vld [vmem:[%s4368_s1 + $0xa0] sm:$0xff] }
   0x9   :  { %v81_v22 = vld [vmem:[%s4368_s1 + $0xa8] sm:$0xff]  ;;  %v82_v23 = vld [vmem:[%s4368_s1 + $0xb0] sm:$0xff]  ;;  %v83_v24 = vld [vmem:[%s4368_s1 + $0xb8] sm:$0xff] }
   0xa   :  { %132 = vrot.lane.b32.xlu0 %v64_v4, %s3121_s9  ;;  %134 = vrot.lane.b32.xlu1 %v65_v5, %s3121_s9  ;;  %v84_v25 = vld [vmem:[%s4368_s1 + $0xc0] sm:$0xff]  ;;  %v85_v26 = vld [vmem:[%s4368_s1 + $0xc8] sm:$0xff] }
   0xb   :  { %v86_v27 = vld [vmem:[%s4368_s1 + $0xd0] sm:$0xff]  ;;  %v87_v28 = vld [vmem:[%s4368_s1 + $0xd8] sm:$0xff]  ;;  %v646_v29 = vld [vmem:[%s4370_s3] sm:$0xff] }
   0xc   :  { %v647_v30 = vld [vmem:[%s4370_s3 + $0x8] sm:$0xff]  ;;  %v88_v32 = vld [vmem:[%s4368_s1 + $0xe0] sm:$0xff]  ;;  %v90_v34 = vld [vmem:[%s4368_s1 + $0xf0] sm:$0xff] }
   0xd   :  { %v3289_v31 = vpack.c.bf16 %v647_v30, %v646_v29  ;;  %v89_v33 = vld [vmem:[%s4368_s1 + $0xe8] sm:$0xff]  ;;  %v91_v35 = vld [vmem:[%s4368_s1 + $0xf8] sm:$0xff]  ;;  %v28_v36 = vld [vmem:[%s4371_s0] sm:$0xff] }
   0xe   :  { %136 = vrot.lane.b32.xlu0 %v66_v6, %s3121_s9  ;;  %138 = vrot.lane.b32.xlu1 %v67_v7, %s3121_s9  ;;  %v30_v37 = vld [vmem:[%s4371_s0 + $0x10] sm:$0xff]  ;;  %v29_v43 = vld [vmem:[%s4371_s0 + $0x8] sm:$0xff] }
   0xf   :  { %3086 = vmatprep.subr.bf16.mxu1 %v3289_v31  ;;  %v31_v44 = vld [vmem:[%s4371_s0 + $0x18] sm:$0xff]  ;;  %v32_v51 = vld [vmem:[%s4371_s0 + $0x20] sm:$0xff]  ;;  %v33_v52 = vld [vmem:[%s4371_s0 + $0x28] sm:$0xff] }
  0x10   :  { %v34_v59 = vld [vmem:[%s4371_s0 + $0x30] sm:$0xff]  ;;  %v35_v60 = vld [vmem:[%s4371_s0 + $0x38] sm:$0xff]  ;;  %v36_v3 = vld [vmem:[%s4371_s0 + $0x40] sm:$0xff] }
  0x11   :  { %v37_v4 = vld [vmem:[%s4371_s0 + $0x48] sm:$0xff] }
  0x12   :  { %140 = vrot.lane.b32.xlu0 %v68_v9, %s3121_s9  ;;  %142 = vrot.lane.b32.xlu1 %v69_v10, %s3121_s9 }
  0x16   :  { %144 = vrot.lane.b32.xlu0 %v70_v11, %s3121_s9  ;;  %146 = vrot.lane.b32.xlu1 %v71_v12, %s3121_s9  ;;  %v38_v11 = vld [vmem:[%s4371_s0 + $0x50] sm:$0xff]  ;;  %v39_v12 = vld [vmem:[%s4371_s0 + $0x58] sm:$0xff] }
  0x1a   :  { %148 = vrot.lane.b32.xlu0 %v72_v13, %s3121_s9  ;;  %150 = vrot.lane.b32.xlu1 %v73_v14, %s3121_s9 }
  0x1e   :  { %152 = vrot.lane.b32.xlu0 %v74_v15, %s3121_s9  ;;  %154 = vrot.lane.b32.xlu1 %v75_v16, %s3121_s9 }
  0x22   :  { %156 = vrot.lane.b32.xlu0 %v76_v17, %s3121_s9  ;;  %158 = vrot.lane.b32.xlu1 %v77_v18, %s3121_s9 }
  0x26   :  { %160 = vrot.lane.b32.xlu0 %v78_v19, %s3121_s9  ;;  %162 = vrot.lane.b32.xlu1 %v79_v20, %s3121_s9  ;;  %v40_v19 = vld [vmem:[%s4371_s0 + $0x60] sm:$0xff]  ;;  %v41_v20 = vld [vmem:[%s4371_s0 + $0x68] sm:$0xff] }
  0x2a   :  { %164 = vrot.lane.b32.xlu0 %v80_v21, %s3121_s9  ;;  %166 = vrot.lane.b32.xlu1 %v81_v22, %s3121_s9 }
  0x2e   :  { %168 = vrot.lane.b32.xlu0 %v82_v23, %s3121_s9  ;;  %170 = vrot.lane.b32.xlu1 %v83_v24, %s3121_s9 }
  0x32   :  { %172 = vrot.lane.b32.xlu0 %v84_v25, %s3121_s9  ;;  %174 = vrot.lane.b32.xlu1 %v85_v26, %s3121_s9 }
  0x36   :  { %176 = vrot.lane.b32.xlu0 %v86_v27, %s3121_s9  ;;  %178 = vrot.lane.b32.xlu1 %v87_v28, %s3121_s9  ;;  %v42_v27 = vld [vmem:[%s4371_s0 + $0x70] sm:$0xff]  ;;  %v43_v28 = vld [vmem:[%s4371_s0 + $0x78] sm:$0xff] }
  0x3a   :  { %180 = vrot.lane.b32.xlu0 %v88_v32, %s3121_s9  ;;  %182 = vrot.lane.b32.xlu1 %v89_v33, %s3121_s9 }
  0x3e   :  { %184 = vrot.lane.b32.xlu0 %v90_v34, %s3121_s9  ;;  %186 = vrot.lane.b32.xlu1 %v91_v35, %s3121_s9 }
  0x74   :  { %v125_v38 = vpop.permute.xlu0 %124  ;;  %v129_v39 = vpop.permute.xlu1 %128 }
  0x75   :  { %v221_v40 = vsel %vm220_vm0, %v28_v36, %v125_v38  ;;  %v223_v41 = vsel %vm220_vm0, %v30_v37, %v129_v39  ;;  %v45_v36 = vld [vmem:[%s4371_s0 + $0x88] sm:$0xff]  ;;  %v44_v37 = vld [vmem:[%s4371_s0 + $0x80] sm:$0xff]  ;;  %v648_v38 = vld [vmem:[%s4370_s3 + $0x10] sm:$0xff] }
  0x76   :  { %v254_v42 = vsel %vm253_vm1, %v221_v40, 0.0  ;;  %v256_v47 = vsel %vm253_vm1, %v223_v41, 0.0  ;;  %v649_v39 = vld [vmem:[%s4370_s3 + $0x18] sm:$0xff] }
  0x77   :  { %2813 = vmatprep.mubr.msk.f32.mxu0 %vm292_vm2, %v254_v42 }
  0x78   :  { %v127_v45 = vpop.permute.xlu0 %126  ;;  %v131_v46 = vpop.permute.xlu1 %130 }
  0x79   :  { %v222_v48 = vsel %vm220_vm0, %v29_v43, %v127_v45  ;;  %v224_v49 = vsel %vm220_vm0, %v31_v44, %v131_v46 }
  0x7a   :  { %v255_v50 = vsel %vm253_vm1, %v222_v48, 0.0  ;;  %v257_v53 = vsel %vm253_vm1, %v224_v49, 0.0  ;;  %v47_v48 = vld [vmem:[%s4371_s0 + $0x98] sm:$0xff]  ;;  %v3089_v49 = vpack.c.bf16 %v649_v39, %v648_v38 }
  0x7b   :  { %2814 = vmatmul.mubr.msk.f32.vlgmr.msra.gmra.mrb[0].mxu0 %vm292_vm2, %v255_v50 }
  0x7c   :  { %2816 = vmatprep.mubr.msk.f32.mxu0 %vm292_vm2, %v256_v47  ;;  %v133_v54 = vpop.permute.xlu0 %132  ;;  %v135_v55 = vpop.permute.xlu1 %134  ;;  %v46_v47 = vld [vmem:[%s4371_s0 + $0x90] sm:$0xff] }
  0x7d   :  { %v225_v56 = vsel %vm220_vm0, %v32_v51, %v133_v54  ;;  %v226_v57 = vsel %vm220_vm0, %v33_v52, %v135_v55 }
  0x7e   :  { %v258_v58 = vsel %vm253_vm1, %v225_v56, 0.0  ;;  %v259_v61 = vsel %vm253_vm1, %v226_v57, 0.0  ;;  %v48_v56 = vld [vmem:[%s4371_s0 + $0xa0] sm:$0xff]  ;;  %v49_v57 = vld [vmem:[%s4371_s0 + $0xa8] sm:$0xff] }
  0x7f   :  { %2817 = vmatmul.mubr.msk.f32.gmra.mrb[2].mxu0 %vm292_vm2, %v257_v53 }
  0x80   :  { %v137_v62 = vpop.permute.xlu0 %136  ;;  %2819 = vmatprep.mubr.msk.f32.mxu0 %vm292_vm2, %v258_v58  ;;  %v139_v63 = vpop.permute.xlu1 %138 }
  0x81   :  { %v227_v0 = vsel %vm220_vm0, %v34_v59, %v137_v62  ;;  %v228_v1 = vsel %vm220_vm0, %v35_v60, %v139_v63  ;;  %v50_v63 = vld [vmem:[%s4371_s0 + $0xb0] sm:$0xff] }
  0x82   :  { %v260_v2 = vsel %vm253_vm1, %v227_v0, 0.0  ;;  %v261_v5 = vsel %vm253_vm1, %v228_v1, 0.0  ;;  %v51_v0 = vld [vmem:[%s4371_s0 + $0xb8] sm:$0xff] }
  0x83   :  { %2820 = vmatmul.mubr.msk.f32.gmra.mrb[4].mxu0 %vm292_vm2, %v259_v61 }
  0x84   :  { %v141_v6 = vpop.permute.xlu0 %140  ;;  %2822 = vmatprep.mubr.msk.f32.mxu0 %vm292_vm2, %v260_v2  ;;  %v143_v7 = vpop.permute.xlu1 %142 }
  0x85   :  { %v229_v8 = vsel %vm220_vm0, %v36_v3, %v141_v6  ;;  %v230_v9 = vsel %vm220_vm0, %v37_v4, %v143_v7  ;;  %v52_v7 = vld [vmem:[%s4371_s0 + $0xc0] sm:$0xff] }
  0x86   :  { %v262_v10 = vsel %vm253_vm1, %v229_v8, 0.0  ;;  %v263_v13 = vsel %vm253_vm1, %v230_v9, 0.0  ;;  %v53_v8 = vld [vmem:[%s4371_s0 + $0xc8] sm:$0xff] }
  0x87   :  { %2823 = vmatmul.mubr.msk.f32.gmra.mrb[6].mxu0 %vm292_vm2, %v261_v5 }
  0x88   :  { %v145_v14 = vpop.permute.xlu0 %144  ;;  %2825 = vmatprep.mubr.msk.f32.mxu0 %vm292_vm2, %v262_v10  ;;  %v147_v15 = vpop.permute.xlu1 %146 }
  0x89   :  { %v231_v16 = vsel %vm220_vm0, %v38_v11, %v145_v14  ;;  %v232_v17 = vsel %vm220_vm0, %v39_v12, %v147_v15  ;;  %v54_v15 = vld [vmem:[%s4371_s0 + $0xd0] sm:$0xff] }
  0x8a   :  { %v264_v18 = vsel %vm253_vm1, %v231_v16, 0.0  ;;  %v265_v21 = vsel %vm253_vm1, %v232_v17, 0.0  ;;  %v55_v16 = vld [vmem:[%s4371_s0 + $0xd8] sm:$0xff] }
  0x8b   :  { %2826 = vmatmul.mubr.msk.f32.gmra.mrb[8].mxu0 %vm292_vm2, %v263_v13 }
  0x8c   :  { %v149_v22 = vpop.permute.xlu0 %148  ;;  %2828 = vmatprep.mubr.msk.f32.mxu0 %vm292_vm2, %v264_v18  ;;  %v151_v23 = vpop.permute.xlu1 %150 }
  0x8d   :  { %v233_v24 = vsel %vm220_vm0, %v40_v19, %v149_v22  ;;  %v234_v25 = vsel %vm220_vm0, %v41_v20, %v151_v23  ;;  %v56_v23 = vld [vmem:[%s4371_s0 + $0xe0] sm:$0xff] }
  0x8e   :  { %v266_v26 = vsel %vm253_vm1, %v233_v24, 0.0  ;;  %v267_v29 = vsel %vm253_vm1, %v234_v25, 0.0  ;;  %v57_v24 = vld [vmem:[%s4371_s0 + $0xe8] sm:$0xff] }
  0x8f   :  { %2829 = vmatmul.mubr.msk.f32.gmra.mrb[10].mxu0 %vm292_vm2, %v265_v21 }
  0x90   :  { %v153_v30 = vpop.permute.xlu0 %152  ;;  %2831 = vmatprep.mubr.msk.f32.mxu0 %vm292_vm2, %v266_v26  ;;  %v155_v32 = vpop.permute.xlu1 %154 }
  0x91   :  { %v235_v33 = vsel %vm220_vm0, %v42_v27, %v153_v30  ;;  %v236_v34 = vsel %vm220_vm0, %v43_v28, %v155_v32  ;;  %v58_v32 = vld [vmem:[%s4371_s0 + $0xf0] sm:$0xff] }
  0x92   :  { %v268_v35 = vsel %vm253_vm1, %v235_v33, 0.0  ;;  %v269_v40 = vsel %vm253_vm1, %v236_v34, 0.0  ;;  %v59_v33 = vld [vmem:[%s4371_s0 + $0xf8] sm:$0xff] }
  0x93   :  { %2832 = vmatmul.mubr.msk.f32.gmra.mrb[12].mxu0 %vm292_vm2, %v267_v29 }
  0x94   :  { %v157_v41 = vpop.permute.xlu0 %156  ;;  %2834 = vmatprep.mubr.msk.f32.mxu0 %vm292_vm2, %v268_v35  ;;  %v159_v42 = vpop.permute.xlu1 %158 }
  0x95   :  { %v238_v43 = vsel %vm220_vm0, %v45_v36, %v159_v42  ;;  %v237_v44 = vsel %vm220_vm0, %v44_v37, %v157_v41  ;;  %v2464_v41 = vld [vmem:[%s4370_s3 + $0x28] sm:$0xff]  ;;  %v2465_v42 = vld [vmem:[%s4370_s3 + $0x30] sm:$0xff] }
  0x96   :  { %v271_v45 = vsel %vm253_vm1, %v238_v43, 0.0  ;;  %v270_v46 = vsel %vm253_vm1, %v237_v44, 0.0  ;;  %v2466_v44 = vld [vmem:[%s4370_s3 + $0x38] sm:$0xff] }
  0x97   :  { %2835 = vmatmul.mubr.msk.f32.gmra.mrb[14].mxu0 %vm292_vm2, %v269_v40  ;;  %2837 = vmatprep.mubr.msk.f32.mxu1 %vm292_vm2, %v270_v46  ;;  %v2463_v40 = vld [vmem:[%s4370_s3 + $0x20] sm:$0xff] }
  0x98   :  { %v161_v50 = vpop.permute.xlu0 %160  ;;  %2838 = vmatmul.mubr.msk.f32.vlgmr.msra.gmra.mrb[0].mxu1 %vm292_vm2, %v271_v45  ;;  %v163_v51 = vpop.permute.xlu1 %162  ;;  %v3093_v43 = vpack.c.bf16 %v2464_v41, %v2463_v40  ;;  %v3097_v45 = vpack.c.bf16 %v2466_v44, %v2465_v42  ;;  %v3522_v46 = vld [vmem:[%s4372_s4] ss:$0 sm:$0xff] }
  0x99   :  { %v239_v52 = vsel %vm220_vm0, %v46_v47, %v161_v50  ;;  %v240_v53 = vsel %vm220_vm0, %v47_v48, %v163_v51  ;;  %3088 = vmatpush3.bf16.msra.mxu1 %v3289_v31 }
  0x9a   :  { %v272_v54 = vsel %vm253_vm1, %v239_v52, 0.0  ;;  %v273_v55 = vsel %vm253_vm1, %v240_v53, 0.0  ;;  %3090 = vmatprep.subr.bf16.mxu1 %v3089_v49  ;;  %3094 = vmatprep.subr.bf16.mxu0 %v3093_v43 }
  0x9b   :  { %2840 = vmatprep.mubr.msk.f32.mxu1 %vm292_vm2, %v272_v54  ;;  %3096 = vmatpush3.bf16.msra.mxu0 %v3093_v43 }
  0x9c   :  { %v165_v58 = vpop.permute.xlu0 %164  ;;  %2841 = vmatmul.mubr.msk.f32.gmra.mrb[2].mxu1 %vm292_vm2, %v273_v55  ;;  %v167_v59 = vpop.permute.xlu1 %166  ;;  %3098 = vmatprep.subr.bf16.mxu0 %v3097_v45 }
  0x9d   :  { %v241_v31 = vsel %vm220_vm0, %v48_v56, %v165_v58  ;;  %v242_v60 = vsel %vm220_vm0, %v49_v57, %v167_v59  ;;  %3092 = vmatpush3.bf16.msra.mxu1 %v3089_v49 }
  0x9e   :  { %v274_v61 = vsel %vm253_vm1, %v241_v31, 0.0  ;;  %v275_v62 = vsel %vm253_vm1, %v242_v60, 0.0 }
  0x9f   :  { %2843 = vmatprep.mubr.msk.f32.mxu1 %vm292_vm2, %v274_v61  ;;  %3100 = vmatpush3.bf16.msra.mxu0 %v3097_v45 }
  0xa0   :  { %v169_v1 = vpop.permute.xlu0 %168  ;;  %2844 = vmatmul.mubr.msk.f32.gmra.mrb[4].mxu1 %vm292_vm2, %v275_v62  ;;  %v171_v2 = vpop.permute.xlu1 %170 }
  0xa1   :  { %v243_v3 = vsel %vm220_vm0, %v50_v63, %v169_v1  ;;  %v244_v4 = vsel %vm220_vm0, %v51_v0, %v171_v2 }
  0xa2   :  { %v276_v5 = vsel %vm253_vm1, %v243_v3, 0.0  ;;  %v277_v6 = vsel %vm253_vm1, %v244_v4, 0.0 }
  0xa3   :  { %2846 = vmatprep.mubr.msk.f32.mxu1 %vm292_vm2, %v276_v5 }
  0xa4   :  { %v173_v9 = vpop.permute.xlu0 %172  ;;  %2847 = vmatmul.mubr.msk.f32.gmra.mrb[6].mxu1 %vm292_vm2, %v277_v6  ;;  %v175_v10 = vpop.permute.xlu1 %174 }
  0xa5   :  { %v245_v11 = vsel %vm220_vm0, %v52_v7, %v173_v9  ;;  %v246_v12 = vsel %vm220_vm0, %v53_v8, %v175_v10 }
  0xa6   :  { %v278_v13 = vsel %vm253_vm1, %v245_v11, 0.0  ;;  %v279_v14 = vsel %vm253_vm1, %v246_v12, 0.0 }
  0xa7   :  { %2849 = vmatprep.mubr.msk.f32.mxu1 %vm292_vm2, %v278_v13 }
  0xa8   :  { %v177_v17 = vpop.permute.xlu0 %176  ;;  %2850 = vmatmul.mubr.msk.f32.gmra.mrb[8].mxu1 %vm292_vm2, %v279_v14  ;;  %v179_v18 = vpop.permute.xlu1 %178 }
  0xa9   :  { %v247_v19 = vsel %vm220_vm0, %v54_v15, %v177_v17  ;;  %v248_v20 = vsel %vm220_vm0, %v55_v16, %v179_v18 }
  0xaa   :  { %v280_v21 = vsel %vm253_vm1, %v247_v19, 0.0  ;;  %v281_v22 = vsel %vm253_vm1, %v248_v20, 0.0 }
  0xab   :  { %2852 = vmatprep.mubr.msk.f32.mxu1 %vm292_vm2, %v280_v21 }
  0xac   :  { %v181_v25 = vpop.permute.xlu0 %180  ;;  %2853 = vmatmul.mubr.msk.f32.gmra.mrb[10].mxu1 %vm292_vm2, %v281_v22  ;;  %v183_v26 = vpop.permute.xlu1 %182 }
  0xad   :  { %v249_v27 = vsel %vm220_vm0, %v56_v23, %v181_v25  ;;  %v250_v28 = vsel %vm220_vm0, %v57_v24, %v183_v26 }
  0xae   :  { %v282_v29 = vsel %vm253_vm1, %v249_v27, 0.0  ;;  %v283_v30 = vsel %vm253_vm1, %v250_v28, 0.0 }
  0xaf   :  { %2855 = vmatprep.mubr.msk.f32.mxu1 %vm292_vm2, %v282_v29 }
  0xb0   :  { %v185_v34 = vpop.permute.xlu0 %184  ;;  %2856 = vmatmul.mubr.msk.f32.gmra.mrb[12].mxu1 %vm292_vm2, %v283_v30  ;;  %v187_v35 = vpop.permute.xlu1 %186 }
  0xb1   :  { %v251_v36 = vsel %vm220_vm0, %v58_v32, %v185_v34  ;;  %v252_v37 = vsel %vm220_vm0, %v59_v33, %v187_v35 }
  0xb2   :  { %v284_v38 = vsel %vm253_vm1, %v251_v36, 0.0  ;;  %v285_v39 = vsel %vm253_vm1, %v252_v37, 0.0 }
  0xb3   :  { %2858 = vmatprep.mubr.msk.f32.mxu1 %vm292_vm2, %v284_v38 }
  0xb4   :  { %2859 = vmatmul.mubr.msk.f32.gmra.mrb[14].mxu1 %vm292_vm2, %v285_v39 }
 0x14e   :  { %v2815_v47 = vpop.f32.mrb[0].mxu0 }
 0x14f   :  { %v461_v48 = vadd.f32 %v2815_v47, %v3522_v46  ;;  %v455_v49 = vpop.f32.mrb[1].mxu0 }
 0x150   :  { %v456_v50 = vadd.f32 %v3522_v46, %v455_v49 }
 0x151   :  { %v615_v53 = vmax.f32 %v461_v48, 0.0 }
 0x152   :  { %v614_v51 = vmax.f32 %v456_v50, 0.0  ;;  %v2818_v52 = vpop.f32.mrb[2].mxu0 }
 0x153   :  { %v471_v54 = vadd.f32 %v2818_v52, %v3522_v46  ;;  %v465_v55 = vpop.f32.mrb[3].mxu0 }
 0x154   :  { %v466_v56 = vadd.f32 %v3522_v46, %v465_v55  ;;  %2869 = vmatprep.mubr.msk.f32.mxu1 %vm655_vm3, %v614_v51 }
 0x155   :  { %2870 = vmatmul.mubr.msk.f32.vlgmr.msra.gmra.mrb[16].mxu1 %vm655_vm3, %v615_v53  ;;  %v617_v59 = vmax.f32 %v471_v54, 0.0 }
 0x156   :  { %v616_v57 = vmax.f32 %v466_v56, 0.0  ;;  %v2821_v58 = vpop.f32.mrb[4].mxu0 }
 0x157   :  { %v481_v31 = vadd.f32 %v2821_v58, %v3522_v46  ;;  %v475_v60 = vpop.f32.mrb[5].mxu0 }
 0x158   :  { %v476_v61 = vadd.f32 %v3522_v46, %v475_v60  ;;  %2872 = vmatprep.mubr.msk.f32.mxu1 %vm655_vm3, %v616_v57 }
 0x159   :  { %2873 = vmatmul.mubr.msk.f32.gmra.mrb[18].mxu1 %vm655_vm3, %v617_v59  ;;  %v619_v0 = vmax.f32 %v481_v31, 0.0 }
 0x15a   :  { %v618_v62 = vmax.f32 %v476_v61, 0.0  ;;  %v2824_v63 = vpop.f32.mrb[6].mxu0 }
 0x15b   :  { %v491_v1 = vadd.f32 %v2824_v63, %v3522_v46  ;;  %v485_v2 = vpop.f32.mrb[7].mxu0 }
 0x15c   :  { %v486_v3 = vadd.f32 %v3522_v46, %v485_v2  ;;  %2875 = vmatprep.mubr.msk.f32.mxu1 %vm655_vm3, %v618_v62 }
 0x15d   :  { %2876 = vmatmul.mubr.msk.f32.gmra.mrb[20].mxu1 %vm655_vm3, %v619_v0  ;;  %v621_v6 = vmax.f32 %v491_v1, 0.0 }
 0x15e   :  { %v620_v4 = vmax.f32 %v486_v3, 0.0  ;;  %v2827_v5 = vpop.f32.mrb[8].mxu0 }
 0x15f   :  { %v501_v7 = vadd.f32 %v2827_v5, %v3522_v46  ;;  %v495_v8 = vpop.f32.mrb[9].mxu0 }
 0x160   :  { %v496_v9 = vadd.f32 %v3522_v46, %v495_v8  ;;  %2878 = vmatprep.mubr.msk.f32.mxu1 %vm655_vm3, %v620_v4 }
 0x161   :  { %2879 = vmatmul.mubr.msk.f32.gmra.mrb[22].mxu1 %vm655_vm3, %v621_v6  ;;  %v623_v12 = vmax.f32 %v501_v7, 0.0 }
 0x162   :  { %v622_v10 = vmax.f32 %v496_v9, 0.0  ;;  %v2830_v11 = vpop.f32.mrb[10].mxu0 }
 0x163   :  { %v511_v13 = vadd.f32 %v2830_v11, %v3522_v46  ;;  %v505_v14 = vpop.f32.mrb[11].mxu0 }
 0x164   :  { %v506_v15 = vadd.f32 %v3522_v46, %v505_v14  ;;  %2881 = vmatprep.mubr.msk.f32.mxu1 %vm655_vm3, %v622_v10 }
 0x165   :  { %2882 = vmatmul.mubr.msk.f32.gmra.mrb[24].mxu1 %vm655_vm3, %v623_v12  ;;  %v625_v18 = vmax.f32 %v511_v13, 0.0 }
 0x166   :  { %v624_v16 = vmax.f32 %v506_v15, 0.0  ;;  %v2833_v17 = vpop.f32.mrb[12].mxu0  ;;  %v2500_v15 = vld [vmem:[%s4370_s3 + $0x40] sm:$0xff] }
 0x167   :  { %v521_v19 = vadd.f32 %v2833_v17, %v3522_v46  ;;  %v515_v20 = vpop.f32.mrb[13].mxu0 }
 0x168   :  { %v516_v21 = vadd.f32 %v3522_v46, %v515_v20  ;;  %2884 = vmatprep.mubr.msk.f32.mxu1 %vm655_vm3, %v624_v16  ;;  %v2501_v16 = vld [vmem:[%s4370_s3 + $0x48] sm:$0xff]  ;;  %v3603_v20 = vld [vmem:[%s4372_s4 + $0x1] ss:$0 sm:$0xff] }
 0x169   :  { %2885 = vmatmul.mubr.msk.f32.gmra.mrb[26].mxu1 %vm655_vm3, %v625_v18  ;;  %v627_v24 = vmax.f32 %v521_v19, 0.0  ;;  %v3101_v17 = vpack.c.bf16 %v2501_v16, %v2500_v15  ;;  %v2503_v18 = vld [vmem:[%s4370_s3 + $0x58] sm:$0xff] }
 0x16a   :  { %v626_v22 = vmax.f32 %v516_v21, 0.0  ;;  %v2836_v23 = vpop.f32.mrb[14].mxu0 }
 0x16b   :  { %v531_v25 = vadd.f32 %v2836_v23, %v3522_v46  ;;  %v525_v26 = vpop.f32.mrb[15].mxu0  ;;  %v2839_v27 = vpop.f32.mrb[0].mxu1  ;;  %3102 = vmatprep.subr.bf16.mxu1 %v3101_v17 }
 0x16c   :  { %v526_v28 = vadd.f32 %v3522_v46, %v525_v26  ;;  %2887 = vmatprep.mubr.msk.f32.mxu1 %vm655_vm3, %v626_v22  ;;  %v535_v29 = vpop.f32.mrb[1].mxu1  ;;  %v541_v34 = vadd.f32 %v2839_v27, %v3522_v46  ;;  %3104 = vmatpush3.bf16.msra.mxu1 %v3101_v17 }
 0x16d   :  { %2888 = vmatmul.mubr.msk.f32.gmra.mrb[28].mxu1 %vm655_vm3, %v627_v24  ;;  %v536_v30 = vadd.f32 %v3522_v46, %v535_v29  ;;  %v629_v33 = vmax.f32 %v531_v25, 0.0 }
 0x16e   :  { %v628_v32 = vmax.f32 %v526_v28, 0.0  ;;  %v631_v39 = vmax.f32 %v541_v34, 0.0 }
 0x16f   :  { %v630_v35 = vmax.f32 %v536_v30, 0.0  ;;  %v2842_v36 = vpop.f32.mrb[2].mxu1 }
 0x170   :  { %2890 = vmatprep.mubr.msk.f32.mxu1 %vm655_vm3, %v628_v32  ;;  %v545_v37 = vpop.f32.mrb[3].mxu1  ;;  %v551_v40 = vadd.f32 %v2842_v36, %v3522_v46 }
 0x171   :  { %2891 = vmatmul.mubr.msk.f32.gmra.mrb[30].mxu1 %vm655_vm3, %v629_v33  ;;  %v546_v38 = vadd.f32 %v3522_v46, %v545_v37 }
 0x172   :  { %2893 = vmatprep.mubr.msk.f32.mxu1 %vm655_vm3, %v630_v35  ;;  %v633_v45 = vmax.f32 %v551_v40, 0.0 }
 0x173   :  { %v632_v41 = vmax.f32 %v546_v38, 0.0  ;;  %v2845_v42 = vpop.f32.mrb[4].mxu1 }
 0x174   :  { %v555_v43 = vpop.f32.mrb[5].mxu1  ;;  %v561_v47 = vadd.f32 %v2845_v42, %v3522_v46 }
 0x175   :  { %2894 = vmatmul.mubr.msk.f32.gmra.mrb[32].mxu1 %vm655_vm3, %v631_v39  ;;  %v556_v44 = vadd.f32 %v3522_v46, %v555_v43 }
 0x176   :  { %2896 = vmatprep.mubr.msk.f32.mxu1 %vm655_vm3, %v632_v41  ;;  %v635_v52 = vmax.f32 %v561_v47, 0.0 }
 0x177   :  { %v634_v48 = vmax.f32 %v556_v44, 0.0  ;;  %v2848_v49 = vpop.f32.mrb[6].mxu1 }
 0x178   :  { %v565_v50 = vpop.f32.mrb[7].mxu1  ;;  %v571_v53 = vadd.f32 %v2848_v49, %v3522_v46 }
 0x179   :  { %2897 = vmatmul.mubr.msk.f32.gmra.mrb[34].mxu1 %vm655_vm3, %v633_v45  ;;  %v566_v51 = vadd.f32 %v3522_v46, %v565_v50 }
 0x17a   :  { %2899 = vmatprep.mubr.msk.f32.mxu1 %vm655_vm3, %v634_v48  ;;  %v637_v58 = vmax.f32 %v571_v53, 0.0 }
 0x17b   :  { %v636_v54 = vmax.f32 %v566_v51, 0.0  ;;  %v2851_v55 = vpop.f32.mrb[8].mxu1 }
 0x17c   :  { %v575_v56 = vpop.f32.mrb[9].mxu1  ;;  %v581_v59 = vadd.f32 %v2851_v55, %v3522_v46 }
 0x17d   :  { %2900 = vmatmul.mubr.msk.f32.gmra.mrb[36].mxu1 %vm655_vm3, %v635_v52  ;;  %v576_v57 = vadd.f32 %v3522_v46, %v575_v56 }
 0x17e   :  { %2902 = vmatprep.mubr.msk.f32.mxu1 %vm655_vm3, %v636_v54  ;;  %v639_v63 = vmax.f32 %v581_v59, 0.0 }
 0x17f   :  { %v638_v31 = vmax.f32 %v576_v57, 0.0  ;;  %v2854_v60 = vpop.f32.mrb[10].mxu1 }
 0x180   :  { %v585_v61 = vpop.f32.mrb[11].mxu1  ;;  %v591_v0 = vadd.f32 %v2854_v60, %v3522_v46 }
 0x181   :  { %2903 = vmatmul.mubr.msk.f32.gmra.mrb[38].mxu1 %vm655_vm3, %v637_v58  ;;  %v586_v62 = vadd.f32 %v3522_v46, %v585_v61 }
 0x182   :  { %2905 = vmatprep.mubr.msk.f32.mxu1 %vm655_vm3, %v638_v31  ;;  %v641_v5 = vmax.f32 %v591_v0, 0.0 }
 0x183   :  { %v640_v1 = vmax.f32 %v586_v62, 0.0  ;;  %v2857_v2 = vpop.f32.mrb[12].mxu1 }
 0x184   :  { %v595_v3 = vpop.f32.mrb[13].mxu1  ;;  %v601_v6 = vadd.f32 %v2857_v2, %v3522_v46 }
 0x185   :  { %2906 = vmatmul.mubr.msk.f32.gmra.mrb[40].mxu1 %vm655_vm3, %v639_v63  ;;  %v596_v4 = vadd.f32 %v3522_v46, %v595_v3 }
 0x186   :  { %2908 = vmatprep.mubr.msk.f32.mxu1 %vm655_vm3, %v640_v1  ;;  %v643_v11 = vmax.f32 %v601_v6, 0.0 }
 0x187   :  { %v642_v7 = vmax.f32 %v596_v4, 0.0  ;;  %v2860_v8 = vpop.f32.mrb[14].mxu1 }
 0x188   :  { %v605_v9 = vpop.f32.mrb[15].mxu1  ;;  %v611_v12 = vadd.f32 %v2860_v8, %v3522_v46 }
 0x189   :  { %2909 = vmatmul.mubr.msk.f32.gmra.mrb[42].mxu1 %vm655_vm3, %v641_v5  ;;  %v606_v10 = vadd.f32 %v3522_v46, %v605_v9  ;;  %v2502_v46 = vld [vmem:[%s4370_s3 + $0x50] sm:$0xff] }
 0x18a   :  { %2911 = vmatprep.mubr.msk.f32.mxu1 %vm655_vm3, %v642_v7  ;;  %v645_v14 = vmax.f32 %v611_v12, 0.0  ;;  %v3105_v19 = vpack.c.bf16 %v2503_v18, %v2502_v46 }
 0x18b   :  { %v644_v13 = vmax.f32 %v606_v10, 0.0 }
 0x18c   :  { %3106 = vmatprep.subr.bf16.mxu1 %v3105_v19 }
 0x18d   :  { %2912 = vmatmul.mubr.msk.f32.gmra.mrb[44].mxu1 %vm655_vm3, %v643_v11 }
 0x18e   :  { %2914 = vmatprep.mubr.msk.f32.mxu1 %vm655_vm3, %v644_v13  ;;  %3108 = vmatpush3.bf16.msra.mxu1 %v3105_v19 }
 0x191   :  { %2915 = vmatmul.mubr.msk.f32.gmra.mrb[46].mxu1 %vm655_vm3, %v645_v14 }
 0x228   :  { %v2871_v21 = vpop.f32.mrb[16].mxu1 }
 0x229   :  { %v3606_v22 = vadd.f32 %v2871_v21, %v3603_v20  ;;  %v818_v23 = vpop.f32.mrb[17].mxu1 }
 0x22a   :  { %v3609_v24 = vadd.f32 %v3603_v20, %v818_v23 }
 0x22b   :  { %v978_v27 = vmax.f32 %v3606_v22, 0.0 }
 0x22c   :  { %v977_v25 = vmax.f32 %v3609_v24, 0.0  ;;  %v2874_v26 = vpop.f32.mrb[18].mxu1 }
 0x22d   :  { %v3614_v28 = vadd.f32 %v2874_v26, %v3603_v20  ;;  %v828_v29 = vpop.f32.mrb[19].mxu1 }
 0x22e   :  { %v3617_v30 = vadd.f32 %v3603_v20, %v828_v29  ;;  %2925 = vmatprep.mubr.msk.f32.mxu0 %vm655_vm3, %v977_v25 }
 0x22f   :  { %2926 = vmatmul.mubr.msk.f32.vlgmr.msra.gmra.mrb[16].mxu0 %vm655_vm3, %v978_v27  ;;  %v980_v34 = vmax.f32 %v3614_v28, 0.0 }
 0x230   :  { %v979_v32 = vmax.f32 %v3617_v30, 0.0  ;;  %v2877_v33 = vpop.f32.mrb[20].mxu1 }
 0x231   :  { %v3628_v35 = vadd.f32 %v2877_v33, %v3603_v20  ;;  %v838_v36 = vpop.f32.mrb[21].mxu1 }
 0x232   :  { %v3631_v37 = vadd.f32 %v3603_v20, %v838_v36  ;;  %2928 = vmatprep.mubr.msk.f32.mxu0 %vm655_vm3, %v979_v32 }
 0x233   :  { %2929 = vmatmul.mubr.msk.f32.gmra.mrb[18].mxu0 %vm655_vm3, %v980_v34  ;;  %v982_v40 = vmax.f32 %v3628_v35, 0.0 }
 0x234   :  { %v981_v38 = vmax.f32 %v3631_v37, 0.0  ;;  %v2880_v39 = vpop.f32.mrb[22].mxu1 }
 0x235   :  { %v3642_v41 = vadd.f32 %v2880_v39, %v3603_v20  ;;  %v848_v42 = vpop.f32.mrb[23].mxu1 }
 0x236   :  { %v3645_v43 = vadd.f32 %v3603_v20, %v848_v42  ;;  %2931 = vmatprep.mubr.msk.f32.mxu0 %vm655_vm3, %v981_v38 }
 0x237   :  { %2932 = vmatmul.mubr.msk.f32.gmra.mrb[20].mxu0 %vm655_vm3, %v982_v40  ;;  %v984_v47 = vmax.f32 %v3642_v41, 0.0 }
 0x238   :  { %v983_v44 = vmax.f32 %v3645_v43, 0.0  ;;  %v2883_v45 = vpop.f32.mrb[24].mxu1 }
 0x239   :  { %v3656_v48 = vadd.f32 %v2883_v45, %v3603_v20  ;;  %v858_v49 = vpop.f32.mrb[25].mxu1 }
 0x23a   :  { %v3659_v50 = vadd.f32 %v3603_v20, %v858_v49  ;;  %2934 = vmatprep.mubr.msk.f32.mxu0 %vm655_vm3, %v983_v44 }
 0x23b   :  { %2935 = vmatmul.mubr.msk.f32.gmra.mrb[22].mxu0 %vm655_vm3, %v984_v47  ;;  %v986_v53 = vmax.f32 %v3656_v48, 0.0 }
 0x23c   :  { %v985_v51 = vmax.f32 %v3659_v50, 0.0  ;;  %v2886_v52 = vpop.f32.mrb[26].mxu1 }
 0x23d   :  { %v3670_v54 = vadd.f32 %v2886_v52, %v3603_v20  ;;  %v868_v55 = vpop.f32.mrb[27].mxu1 }
 0x23e   :  { %v3673_v56 = vadd.f32 %v3603_v20, %v868_v55  ;;  %2937 = vmatprep.mubr.msk.f32.mxu0 %vm655_vm3, %v985_v51 }
 0x23f   :  { %2938 = vmatmul.mubr.msk.f32.gmra.mrb[24].mxu0 %vm655_vm3, %v986_v53  ;;  %v988_v59 = vmax.f32 %v3670_v54, 0.0 }
 0x240   :  { %v987_v57 = vmax.f32 %v3673_v56, 0.0  ;;  %v2889_v58 = vpop.f32.mrb[28].mxu1 }
 0x241   :  { %v3684_v31 = vadd.f32 %v2889_v58, %v3603_v20  ;;  %v878_v60 = vpop.f32.mrb[29].mxu1 }
 0x242   :  { %v3687_v61 = vadd.f32 %v3603_v20, %v878_v60  ;;  %2940 = vmatprep.mubr.msk.f32.mxu0 %vm655_vm3, %v987_v57 }
 0x243   :  { %2941 = vmatmul.mubr.msk.f32.gmra.mrb[26].mxu0 %vm655_vm3, %v988_v59  ;;  %v990_v0 = vmax.f32 %v3684_v31, 0.0 }
 0x244   :  { %v989_v62 = vmax.f32 %v3687_v61, 0.0  ;;  %v2892_v63 = vpop.f32.mrb[30].mxu1 }
 0x245   :  { %v3698_v1 = vadd.f32 %v2892_v63, %v3603_v20  ;;  %v888_v2 = vpop.f32.mrb[31].mxu1 }
 0x246   :  { %v3701_v3 = vadd.f32 %v3603_v20, %v888_v2  ;;  %2943 = vmatprep.mubr.msk.f32.mxu0 %vm655_vm3, %v989_v62 }
 0x247   :  { %2944 = vmatmul.mubr.msk.f32.gmra.mrb[28].mxu0 %vm655_vm3, %v990_v0  ;;  %v992_v6 = vmax.f32 %v3698_v1, 0.0 }
 0x248   :  { %v991_v4 = vmax.f32 %v3701_v3, 0.0  ;;  %v2895_v5 = vpop.f32.mrb[32].mxu1 }
 0x249   :  { %v3712_v7 = vadd.f32 %v2895_v5, %v3603_v20  ;;  %v898_v8 = vpop.f32.mrb[33].mxu1 }
 0x24a   :  { %v3715_v9 = vadd.f32 %v3603_v20, %v898_v8  ;;  %2946 = vmatprep.mubr.msk.f32.mxu0 %vm655_vm3, %v991_v4 }
 0x24b   :  { %2947 = vmatmul.mubr.msk.f32.gmra.mrb[30].mxu0 %vm655_vm3, %v992_v6  ;;  %v994_v12 = vmax.f32 %v3712_v7, 0.0 }
 0x24c   :  { %v4391_v10 = vmax.f32 %v3715_v9, 0.0  ;;  %v2898_v11 = vpop.f32.mrb[34].mxu1  ;;  %v4392_v1 = vmax.f32 %v3715_v9, 0.0 }
 0x24d   :  { %v3726_v13 = vadd.f32 %v2898_v11, %v3603_v20  ;;  %v908_v14 = vpop.f32.mrb[35].mxu1 }
 0x24e   :  { %v3729_v15 = vadd.f32 %v3603_v20, %v908_v14  ;;  %2949 = vmatprep.mubr.msk.f32.mxu0 %vm655_vm3, %v4391_v10 }
 0x24f   :  { %2950 = vmatmul.mubr.msk.f32.gmra.mrb[32].mxu0 %vm655_vm3, %v994_v12  ;;  %v4390_v17 = vmax.f32 %v3726_v13, 0.0 }
 0x250   :  { %v4389_v16 = vmax.f32 %v3729_v15, 0.0  ;;  %v2901_v46 = vpop.f32.mrb[36].mxu1  ;;  %v4394_v7 = vmax.f32 %v3729_v15, 0.0 }
 0x251   :  { %v3740_v18 = vadd.f32 %v2901_v46, %v3603_v20  ;;  %v918_v19 = vpop.f32.mrb[37].mxu1 }
 0x252   :  { %v3743_v21 = vadd.f32 %v3603_v20, %v918_v19  ;;  %2952 = vmatprep.mubr.msk.f32.mxu0 %vm655_vm3, %v4389_v16 }
 0x253   :  { %2953 = vmatmul.mubr.msk.f32.gmra.mrb[34].mxu0 %vm655_vm3, %v4390_v17  ;;  %v4388_v29 = vmax.f32 %v3740_v18, 0.0 }
 0x254   :  { %v4387_v23 = vmax.f32 %v3743_v21, 0.0  ;;  %v2904_v26 = vpop.f32.mrb[38].mxu1 }
 0x255   :  { %v3754_v33 = vadd.f32 %v2904_v26, %v3603_v20  ;;  %v928_v36 = vpop.f32.mrb[39].mxu1 }
 0x256   :  { %v3757_v39 = vadd.f32 %v3603_v20, %v928_v36  ;;  %2955 = vmatprep.mubr.msk.f32.mxu0 %vm655_vm3, %v4387_v23 }
 0x257   :  { %2956 = vmatmul.mubr.msk.f32.gmra.mrb[36].mxu0 %vm655_vm3, %v4388_v29  ;;  %v4386_v49 = vmax.f32 %v3754_v33, 0.0 }
 0x258   :  { %v4385_v42 = vmax.f32 %v3757_v39, 0.0  ;;  %v2907_v45 = vpop.f32.mrb[40].mxu1 }
 0x259   :  { %v3768_v52 = vadd.f32 %v2907_v45, %v3603_v20  ;;  %v938_v55 = vpop.f32.mrb[41].mxu1 }
 0x25a   :  { %v3771_v58 = vadd.f32 %v3603_v20, %v938_v55  ;;  %2958 = vmatprep.mubr.msk.f32.mxu0 %vm655_vm3, %v4385_v42 }
 0x25b   :  { %2959 = vmatmul.mubr.msk.f32.gmra.mrb[38].mxu0 %vm655_vm3, %v4386_v49  ;;  %v4384_v2 = vmax.f32 %v3768_v52, 0.0 }
 0x25c   :  { %v4377_v60 = vmax.f32 %v3771_v58, 0.0  ;;  %v2910_v63 = vpop.f32.mrb[42].mxu1 }
 0x25d   :  { %v3782_v5 = vadd.f32 %v2910_v63, %v3603_v20  ;;  %v948_v8 = vpop.f32.mrb[43].mxu1 }
 0x25e   :  { %v3785_v11 = vadd.f32 %v3603_v20, %v948_v8  ;;  %2961 = vmatprep.mubr.msk.f32.mxu0 %vm655_vm3, %v4377_v60 }
 0x25f   :  { %2962 = vmatmul.mubr.msk.f32.gmra.mrb[40].mxu0 %vm655_vm3, %v4384_v2  ;;  %v4379_v19 = vmax.f32 %v3782_v5, 0.0 }
 0x260   :  { %v4378_v14 = vmax.f32 %v3785_v11, 0.0  ;;  %v2913_v46 = vpop.f32.mrb[44].mxu1 }
 0x261   :  { %v3796_v26 = vadd.f32 %v2913_v46, %v3603_v20  ;;  %v958_v36 = vpop.f32.mrb[45].mxu1 }
 0x262   :  { %v3799_v45 = vadd.f32 %v3603_v20, %v958_v36  ;;  %2964 = vmatprep.mubr.msk.f32.mxu0 %vm655_vm3, %v4378_v14 }
 0x263   :  { %2965 = vmatmul.mubr.msk.f32.gmra.mrb[42].mxu0 %vm655_vm3, %v4379_v19  ;;  %v4382_v8 = vmax.f32 %v3796_v26, 0.0 }
 0x264   :  { %v4380_v55 = vmax.f32 %v3799_v45, 0.0  ;;  %v2916_v63 = vpop.f32.mrb[46].mxu1 }
 0x265   :  { %v3810_v46 = vadd.f32 %v2916_v63, %v3603_v20  ;;  %v968_v60 = vpop.f32.mrb[47].mxu1  ;;  %v1769_v63 = vld [vmem:[%s4373_s5 + $0x10] sm:$0xff] }
 0x266   :  { %v3813_v36 = vadd.f32 %v3603_v20, %v968_v60  ;;  %2967 = vmatprep.mubr.msk.f32.mxu0 %vm655_vm3, %v4380_v55  ;;  %v1767_v20 = vld [vmem:[%s4373_s5] sm:$0xff]  ;;  %v1768_v60 = vld [vmem:[%s4373_s5 + $0x8] sm:$0xff] }
 0x267   :  { %2968 = vmatmul.mubr.msk.f32.gmra.mrb[44].mxu0 %vm655_vm3, %v4382_v8  ;;  %v4383_v19 = vmax.f32 %v3810_v46, 0.0  ;;  %v3109_v55 = vpack.c.bf16 %v1768_v60, %v1767_v20 }
 0x268   :  { %v4381_v14 = vmax.f32 %v3813_v36, 0.0 }
 0x269   :  { %3110 = vmatprep.subr.bf16.mxu0 %v3109_v55 }
 0x26a   :  { %2970 = vmatprep.mubr.msk.f32.mxu0 %vm655_vm3, %v4381_v14  ;;  %v1770_v14 = vld [vmem:[%s4373_s5 + $0x18] sm:$0xff]  ;;  %3112 = vmatpush3.bf16.msra.mxu0 %v3109_v55 }
 0x26b   :  { %2971 = vmatmul.mubr.msk.f32.gmra.mrb[46].mxu0 %vm655_vm3, %v4383_v19  ;;  %v3113_v8 = vpack.c.bf16 %v1770_v14, %v1769_v63  ;;  %v3844_v19 = vld [vmem:[%s4372_s4 + $0x2] ss:$0 sm:$0xff] }
 0x26d   :  { %3114 = vmatprep.subr.bf16.mxu0 %v3113_v8 }
 0x26e   :  { %3116 = vmatpush3.bf16.msra.mxu0 %v3113_v8 }
 0x302   :  { %v2927_v2 = vpop.f32.mrb[16].mxu0 }
 0x303   :  { %v1187_v42 = vadd.f32 %v2927_v2, %v3844_v19  ;;  %v1181_v49 = vpop.f32.mrb[17].mxu0 }
 0x304   :  { %v1182_v20 = vadd.f32 %v3844_v19, %v1181_v49 }
 0x305   :  { %v1341_v29 = vmax.f32 %v1187_v42, 0.0 }
 0x306   :  { %v1340_v60 = vmax.f32 %v1182_v20, 0.0  ;;  %v2930_v23 = vpop.f32.mrb[18].mxu0 }
 0x307   :  { %v1197_v14 = vadd.f32 %v2930_v23, %v3844_v19  ;;  %v1191_v63 = vpop.f32.mrb[19].mxu0 }
 0x308   :  { %v1192_v55 = vadd.f32 %v3844_v19, %v1191_v63  ;;  %2981 = vmatprep.mubr.msk.f32.mxu1 %vm655_vm3, %v1340_v60 }
 0x309   :  { %2982 = vmatmul.mubr.msk.f32.vlgmr.msra.gmra.mrb[48].mxu1 %vm655_vm3, %v1341_v29  ;;  %v1343_v17 = vmax.f32 %v1197_v14, 0.0 }
 0x30a   :  { %v1342_v8 = vmax.f32 %v1192_v55, 0.0  ;;  %v2933_v16 = vpop.f32.mrb[20].mxu0 }
 0x30b   :  { %v1207_v2 = vadd.f32 %v2933_v16, %v3844_v19  ;;  %v1201_v10 = vpop.f32.mrb[21].mxu0 }
 0x30c   :  { %v1202_v49 = vadd.f32 %v3844_v19, %v1201_v10  ;;  %2984 = vmatprep.mubr.msk.f32.mxu1 %vm655_vm3, %v1342_v8 }
 0x30d   :  { %2985 = vmatmul.mubr.msk.f32.gmra.mrb[50].mxu1 %vm655_vm3, %v1343_v17  ;;  %v1345_v20 = vmax.f32 %v1207_v2, 0.0 }
 0x30e   :  { %v1344_v23 = vmax.f32 %v1202_v49, 0.0  ;;  %v2936_v42 = vpop.f32.mrb[22].mxu0 }
 0x30f   :  { %v1217_v63 = vadd.f32 %v2936_v42, %v3844_v19  ;;  %v1211_v60 = vpop.f32.mrb[23].mxu0 }
 0x310   :  { %v1212_v29 = vadd.f32 %v3844_v19, %v1211_v60  ;;  %2987 = vmatprep.mubr.msk.f32.mxu1 %vm655_vm3, %v1344_v23 }
 0x311   :  { %2988 = vmatmul.mubr.msk.f32.gmra.mrb[52].mxu1 %vm655_vm3, %v1345_v20  ;;  %v1347_v55 = vmax.f32 %v1217_v63, 0.0 }
 0x312   :  { %v1346_v16 = vmax.f32 %v1212_v29, 0.0  ;;  %v2939_v14 = vpop.f32.mrb[24].mxu0 }
 0x313   :  { %v1227_v10 = vadd.f32 %v2939_v14, %v3844_v19  ;;  %v1221_v8 = vpop.f32.mrb[25].mxu0 }
 0x314   :  { %v1222_v17 = vadd.f32 %v3844_v19, %v1221_v8  ;;  %2990 = vmatprep.mubr.msk.f32.mxu1 %vm655_vm3, %v1346_v16 }
 0x315   :  { %2991 = vmatmul.mubr.msk.f32.gmra.mrb[54].mxu1 %vm655_vm3, %v1347_v55  ;;  %v1349_v42 = vmax.f32 %v1227_v10, 0.0 }
 0x316   :  { %v1348_v2 = vmax.f32 %v1222_v17, 0.0  ;;  %v2942_v49 = vpop.f32.mrb[26].mxu0 }
 0x317   :  { %v1237_v60 = vadd.f32 %v2942_v49, %v3844_v19  ;;  %v1231_v23 = vpop.f32.mrb[27].mxu0 }
 0x318   :  { %v1232_v20 = vadd.f32 %v3844_v19, %v1231_v23  ;;  %2993 = vmatprep.mubr.msk.f32.mxu1 %vm655_vm3, %v1348_v2 }
 0x319   :  { %2994 = vmatmul.mubr.msk.f32.gmra.mrb[56].mxu1 %vm655_vm3, %v1349_v42  ;;  %v1351_v14 = vmax.f32 %v1237_v60, 0.0 }
 0x31a   :  { %v1350_v63 = vmax.f32 %v1232_v20, 0.0  ;;  %v2945_v29 = vpop.f32.mrb[28].mxu0 }
 0x31b   :  { %v1247_v8 = vadd.f32 %v2945_v29, %v3844_v19  ;;  %v1241_v16 = vpop.f32.mrb[29].mxu0 }
 0x31c   :  { %v1242_v55 = vadd.f32 %v3844_v19, %v1241_v16  ;;  %2996 = vmatprep.mubr.msk.f32.mxu1 %vm655_vm3, %v1350_v63 }
 0x31d   :  { %2997 = vmatmul.mubr.msk.f32.gmra.mrb[58].mxu1 %vm655_vm3, %v1351_v14  ;;  %v1353_v49 = vmax.f32 %v1247_v8, 0.0 }
 0x31e   :  { %v1352_v10 = vmax.f32 %v1242_v55, 0.0  ;;  %v2948_v17 = vpop.f32.mrb[30].mxu0 }
 0x31f   :  { %v1257_v23 = vadd.f32 %v2948_v17, %v3844_v19  ;;  %v1251_v2 = vpop.f32.mrb[31].mxu0 }
 0x320   :  { %v1252_v42 = vadd.f32 %v3844_v19, %v1251_v2  ;;  %2999 = vmatprep.mubr.msk.f32.mxu1 %vm655_vm3, %v1352_v10 }
 0x321   :  { %3000 = vmatmul.mubr.msk.f32.gmra.mrb[60].mxu1 %vm655_vm3, %v1353_v49  ;;  %v1355_v29 = vmax.f32 %v1257_v23, 0.0 }
 0x322   :  { %v1354_v60 = vmax.f32 %v1252_v42, 0.0  ;;  %v2951_v20 = vpop.f32.mrb[32].mxu0 }
 0x323   :  { %v1267_v16 = vadd.f32 %v2951_v20, %v3844_v19  ;;  %v1261_v63 = vpop.f32.mrb[33].mxu0 }
 0x324   :  { %v1262_v14 = vadd.f32 %v3844_v19, %v1261_v63  ;;  %3002 = vmatprep.mubr.msk.f32.mxu1 %vm655_vm3, %v1354_v60 }
 0x325   :  { %3003 = vmatmul.mubr.msk.f32.gmra.mrb[62].mxu1 %vm655_vm3, %v1355_v29  ;;  %v1357_v17 = vmax.f32 %v1267_v16, 0.0 }
 0x326   :  { %v1356_v8 = vmax.f32 %v1262_v14, 0.0  ;;  %v2954_v55 = vpop.f32.mrb[34].mxu0 }
 0x327   :  { %v1277_v2 = vadd.f32 %v2954_v55, %v3844_v19  ;;  %v1271_v10 = vpop.f32.mrb[35].mxu0 }
 0x328   :  { %v1272_v49 = vadd.f32 %v3844_v19, %v1271_v10  ;;  %3005 = vmatprep.mubr.msk.f32.mxu1 %vm655_vm3, %v1356_v8 }
 0x329   :  { %3006 = vmatmul.mubr.msk.f32.gmra.mrb[64].mxu1 %vm655_vm3, %v1357_v17  ;;  %v1359_v20 = vmax.f32 %v1277_v2, 0.0 }
 0x32a   :  { %v1358_v23 = vmax.f32 %v1272_v49, 0.0  ;;  %v2957_v42 = vpop.f32.mrb[36].mxu0 }
 0x32b   :  { %v1287_v63 = vadd.f32 %v2957_v42, %v3844_v19  ;;  %v1281_v60 = vpop.f32.mrb[37].mxu0 }
 0x32c   :  { %v1282_v29 = vadd.f32 %v3844_v19, %v1281_v60  ;;  %3008 = vmatprep.mubr.msk.f32.mxu1 %vm655_vm3, %v1358_v23 }
 0x32d   :  { %3009 = vmatmul.mubr.msk.f32.gmra.mrb[66].mxu1 %vm655_vm3, %v1359_v20  ;;  %v1361_v55 = vmax.f32 %v1287_v63, 0.0 }
 0x32e   :  { %v1360_v16 = vmax.f32 %v1282_v29, 0.0  ;;  %v2960_v14 = vpop.f32.mrb[38].mxu0 }
 0x32f   :  { %v1297_v10 = vadd.f32 %v2960_v14, %v3844_v19  ;;  %v1291_v8 = vpop.f32.mrb[39].mxu0 }
 0x330   :  { %v1292_v17 = vadd.f32 %v3844_v19, %v1291_v8  ;;  %3011 = vmatprep.mubr.msk.f32.mxu1 %vm655_vm3, %v1360_v16 }
 0x331   :  { %3012 = vmatmul.mubr.msk.f32.gmra.mrb[68].mxu1 %vm655_vm3, %v1361_v55  ;;  %v1363_v42 = vmax.f32 %v1297_v10, 0.0 }
 0x332   :  { %v1362_v2 = vmax.f32 %v1292_v17, 0.0  ;;  %v2963_v49 = vpop.f32.mrb[40].mxu0 }
 0x333   :  { %v1307_v60 = vadd.f32 %v2963_v49, %v3844_v19  ;;  %v1301_v23 = vpop.f32.mrb[41].mxu0 }
 0x334   :  { %v1302_v20 = vadd.f32 %v3844_v19, %v1301_v23  ;;  %3014 = vmatprep.mubr.msk.f32.mxu1 %vm655_vm3, %v1362_v2 }
 0x335   :  { %3015 = vmatmul.mubr.msk.f32.gmra.mrb[70].mxu1 %vm655_vm3, %v1363_v42  ;;  %v1365_v14 = vmax.f32 %v1307_v60, 0.0 }
 0x336   :  { %v1364_v63 = vmax.f32 %v1302_v20, 0.0  ;;  %v2966_v29 = vpop.f32.mrb[42].mxu0 }
 0x337   :  { %v1317_v8 = vadd.f32 %v2966_v29, %v3844_v19  ;;  %v1311_v16 = vpop.f32.mrb[43].mxu0 }
 0x338   :  { %v1312_v55 = vadd.f32 %v3844_v19, %v1311_v16  ;;  %3017 = vmatprep.mubr.msk.f32.mxu1 %vm655_vm3, %v1364_v63 }
 0x339   :  { %3018 = vmatmul.mubr.msk.f32.gmra.mrb[72].mxu1 %vm655_vm3, %v1365_v14  ;;  %v1367_v49 = vmax.f32 %v1317_v8, 0.0 }
 0x33a   :  { %v1366_v10 = vmax.f32 %v1312_v55, 0.0  ;;  %v2969_v17 = vpop.f32.mrb[44].mxu0 }
 0x33b   :  { %v1327_v23 = vadd.f32 %v2969_v17, %v3844_v19  ;;  %v1321_v2 = vpop.f32.mrb[45].mxu0 }
 0x33c   :  { %v1322_v42 = vadd.f32 %v3844_v19, %v1321_v2  ;;  %3020 = vmatprep.mubr.msk.f32.mxu1 %vm655_vm3, %v1366_v10 }
 0x33d   :  { %3021 = vmatmul.mubr.msk.f32.gmra.mrb[74].mxu1 %vm655_vm3, %v1367_v49  ;;  %v1369_v29 = vmax.f32 %v1327_v23, 0.0  ;;  %v3915_v49 = vld [vmem:[%s4372_s4 + $0x3] ss:$0 sm:$0xff] }
 0x33e   :  { %v1368_v60 = vmax.f32 %v1322_v42, 0.0  ;;  %v2972_v20 = vpop.f32.mrb[46].mxu0 }
 0x33f   :  { %v1337_v16 = vadd.f32 %v2972_v20, %v3844_v19  ;;  %v1331_v63 = vpop.f32.mrb[47].mxu0 }
 0x340   :  { %v1332_v14 = vadd.f32 %v3844_v19, %v1331_v63  ;;  %3023 = vmatprep.mubr.msk.f32.mxu1 %vm655_vm3, %v1368_v60 }
 0x341   :  { %3024 = vmatmul.mubr.msk.f32.gmra.mrb[76].mxu1 %vm655_vm3, %v1369_v29  ;;  %v1371_v55 = vmax.f32 %v1337_v16, 0.0 }
 0x342   :  { %v1370_v8 = vmax.f32 %v1332_v14, 0.0 }
 0x344   :  { %3026 = vmatprep.mubr.msk.f32.mxu1 %vm655_vm3, %v1370_v8 }
 0x345   :  { %3027 = vmatmul.mubr.msk.f32.gmra.mrb[78].mxu1 %vm655_vm3, %v1371_v55 }
 0x3dc   :  { %v2983_v10 = vpop.f32.mrb[48].mxu1 }
 0x3dd   :  { %v1699_v17 = vadd.f32 %v2983_v10, %v978_v27  ;;  %v1539_v19 = vpop.f32.mrb[49].mxu1 }
 0x3de   :  { %v1698_v23 = vadd.f32 %v1539_v19, %v977_v25 }
 0x3df   :  { %v1736_v60 = vadd.f32 %v3915_v49, %v1699_v17 }
 0x3e0   :  { %v1735_v2 = vadd.f32 %v3915_v49, %v1698_v23  ;;  %v2986_v42 = vpop.f32.mrb[50].mxu1 }
 0x3e1   :  { %v1701_v20 = vadd.f32 %v2986_v42, %v980_v34  ;;  %v1549_v29 = vpop.f32.mrb[51].mxu1 }
 0x3e2   :  { %v1700_v22 = vadd.f32 %v1549_v29, %v979_v32  ;;  %3037 = vmatprep.mubr.msk.f32.mxu0 %vm655_vm3, %v1735_v2 }
 0x3e3   :  { %3038 = vmatmul.mubr.msk.f32.vlgmr.msra.gmra.mrb[48].mxu0 %vm655_vm3, %v1736_v60  ;;  %v1738_v25 = vadd.f32 %v3915_v49, %v1701_v20 }
 0x3e4   :  { %v1737_v27 = vadd.f32 %v3915_v49, %v1700_v22  ;;  %v2989_v24 = vpop.f32.mrb[52].mxu1 }
 0x3e5   :  { %v1703_v16 = vadd.f32 %v2989_v24, %v982_v40  ;;  %v1559_v63 = vpop.f32.mrb[53].mxu1 }
 0x3e6   :  { %v1702_v28 = vadd.f32 %v1559_v63, %v981_v38  ;;  %3040 = vmatprep.mubr.msk.f32.mxu0 %vm655_vm3, %v1737_v27  ;;  %v4393_v27 = vmax.f32 %v3726_v13, 0.0  ;;  %v4396_v13 = vmax.f32 %v3743_v21, 0.0 }
 0x3e7   :  { %3041 = vmatmul.mubr.msk.f32.gmra.mrb[50].mxu0 %vm655_vm3, %v1738_v25  ;;  %v1740_v34 = vadd.f32 %v3915_v49, %v1703_v16 }
 0x3e8   :  { %v1739_v30 = vadd.f32 %v3915_v49, %v1702_v28  ;;  %v2992_v32 = vpop.f32.mrb[54].mxu1  ;;  %v4395_v28 = vmax.f32 %v3740_v18, 0.0  ;;  %v4398_v18 = vmax.f32 %v3757_v39, 0.0 }
 0x3e9   :  { %v1705_v14 = vadd.f32 %v2992_v32, %v984_v47  ;;  %v1569_v8 = vpop.f32.mrb[55].mxu1 }
 0x3ea   :  { %v1704_v35 = vadd.f32 %v1569_v8, %v983_v44  ;;  %3043 = vmatprep.mubr.msk.f32.mxu0 %vm655_vm3, %v1739_v30 }
 0x3eb   :  { %3044 = vmatmul.mubr.msk.f32.gmra.mrb[52].mxu0 %vm655_vm3, %v1740_v34  ;;  %v1742_v40 = vadd.f32 %v3915_v49, %v1705_v14 }
 0x3ec   :  { %v1741_v37 = vadd.f32 %v3915_v49, %v1704_v35  ;;  %v2995_v38 = vpop.f32.mrb[56].mxu1  ;;  %v4397_v35 = vmax.f32 %v3754_v33, 0.0  ;;  %v4400_v33 = vmax.f32 %v3771_v58, 0.0 }
 0x3ed   :  { %v1707_v55 = vadd.f32 %v2995_v38, %v986_v53  ;;  %v1579_v10 = vpop.f32.mrb[57].mxu1 }
 0x3ee   :  { %v1706_v41 = vadd.f32 %v1579_v10, %v985_v51  ;;  %3046 = vmatprep.mubr.msk.f32.mxu0 %vm655_vm3, %v1741_v37 }
 0x3ef   :  { %3047 = vmatmul.mubr.msk.f32.gmra.mrb[54].mxu0 %vm655_vm3, %v1742_v40  ;;  %v1744_v47 = vadd.f32 %v3915_v49, %v1707_v55 }
 0x3f0   :  { %v1743_v43 = vadd.f32 %v3915_v49, %v1706_v41  ;;  %v2998_v44 = vpop.f32.mrb[58].mxu1  ;;  %v4399_v41 = vmax.f32 %v3768_v52, 0.0  ;;  %v4402_v52 = vmax.f32 %v3785_v11, 0.0 }
 0x3f1   :  { %v1709_v17 = vadd.f32 %v2998_v44, %v988_v59  ;;  %v1589_v19 = vpop.f32.mrb[59].mxu1 }
 0x3f2   :  { %v1708_v48 = vadd.f32 %v1589_v19, %v987_v57  ;;  %3049 = vmatprep.mubr.msk.f32.mxu0 %vm655_vm3, %v1743_v43 }
 0x3f3   :  { %3050 = vmatmul.mubr.msk.f32.gmra.mrb[56].mxu0 %vm655_vm3, %v1744_v47  ;;  %v1746_v53 = vadd.f32 %v3915_v49, %v1709_v17 }
 0x3f4   :  { %v1745_v50 = vadd.f32 %v3915_v49, %v1708_v48  ;;  %v3001_v51 = vpop.f32.mrb[60].mxu1  ;;  %v4401_v48 = vmax.f32 %v3782_v5, 0.0  ;;  %v4404_v5 = vmax.f32 %v3799_v45, 0.0 }
 0x3f5   :  { %v1711_v23 = vadd.f32 %v3001_v51, %v990_v0  ;;  %v1599_v2 = vpop.f32.mrb[61].mxu1 }
 0x3f6   :  { %v1710_v54 = vadd.f32 %v1599_v2, %v989_v62  ;;  %3052 = vmatprep.mubr.msk.f32.mxu0 %vm655_vm3, %v1745_v50 }
 0x3f7   :  { %3053 = vmatmul.mubr.msk.f32.gmra.mrb[58].mxu0 %vm655_vm3, %v1746_v53  ;;  %v1748_v59 = vadd.f32 %v3915_v49, %v1711_v23 }
 0x3f8   :  { %v1747_v56 = vadd.f32 %v3915_v49, %v1710_v54  ;;  %v3004_v57 = vpop.f32.mrb[62].mxu1  ;;  %v4403_v54 = vmax.f32 %v3796_v26, 0.0  ;;  %v4406_v26 = vmax.f32 %v3813_v36, 0.0 }
 0x3f9   :  { %v1713_v42 = vadd.f32 %v3004_v57, %v992_v6  ;;  %v1609_v60 = vpop.f32.mrb[63].mxu1 }
 0x3fa   :  { %v1712_v31 = vadd.f32 %v1609_v60, %v991_v4  ;;  %3055 = vmatprep.mubr.msk.f32.mxu0 %vm655_vm3, %v1747_v56 }
 0x3fb   :  { %3056 = vmatmul.mubr.msk.f32.gmra.mrb[60].mxu0 %vm655_vm3, %v1748_v59  ;;  %v1750_v0 = vadd.f32 %v3915_v49, %v1713_v42 }
 0x3fc   :  { %v1749_v61 = vadd.f32 %v3915_v49, %v1712_v31  ;;  %v3007_v62 = vpop.f32.mrb[64].mxu1  ;;  %v4405_v31 = vmax.f32 %v3810_v46, 0.0  ;;  %v4046_v46 = vld [vmem:[%s4374_s6] ss:$0 sm:$0xff] }
 0x3fd   :  { %v1715_v20 = vadd.f32 %v3007_v62, %v994_v12  ;;  %v1619_v29 = vpop.f32.mrb[65].mxu1 }
 0x3fe   :  { %v1714_v6 = vadd.f32 %v1619_v29, %v4392_v1  ;;  %3058 = vmatprep.mubr.msk.f32.mxu0 %vm655_vm3, %v1749_v61 }
 0x3ff   :  { %3059 = vmatmul.mubr.msk.f32.gmra.mrb[62].mxu0 %vm655_vm3, %v1750_v0  ;;  %v1752_v22 = vadd.f32 %v3915_v49, %v1715_v20 }
 0x400   :  { %v1751_v3 = vadd.f32 %v3915_v49, %v1714_v6  ;;  %v3010_v4 = vpop.f32.mrb[66].mxu1 }
 0x401   :  { %v1717_v24 = vadd.f32 %v3010_v4, %v4393_v27  ;;  %v1629_v25 = vpop.f32.mrb[67].mxu1 }
 0x402   :  { %v1716_v12 = vadd.f32 %v1629_v25, %v4394_v7  ;;  %3061 = vmatprep.mubr.msk.f32.mxu0 %vm655_vm3, %v1751_v3 }
 0x403   :  { %3062 = vmatmul.mubr.msk.f32.gmra.mrb[64].mxu0 %vm655_vm3, %v1752_v22  ;;  %v1754_v63 = vadd.f32 %v3915_v49, %v1717_v24 }
 0x404   :  { %v1753_v9 = vadd.f32 %v3915_v49, %v1716_v12  ;;  %v3013_v16 = vpop.f32.mrb[68].mxu1 }
 0x405   :  { %v1719_v30 = vadd.f32 %v3013_v16, %v4395_v28  ;;  %v1639_v32 = vpop.f32.mrb[69].mxu1 }
 0x406   :  { %v1718_v34 = vadd.f32 %v1639_v32, %v4396_v13  ;;  %3064 = vmatprep.mubr.msk.f32.mxu0 %vm655_vm3, %v1753_v9 }
 0x407   :  { %3065 = vmatmul.mubr.msk.f32.gmra.mrb[66].mxu0 %vm655_vm3, %v1754_v63  ;;  %v1756_v8 = vadd.f32 %v3915_v49, %v1719_v30 }
 0x408   :  { %v1755_v15 = vadd.f32 %v3915_v49, %v1718_v34  ;;  %v3016_v14 = vpop.f32.mrb[70].mxu1 }
 0x409   :  { %v1721_v37 = vadd.f32 %v3016_v14, %v4397_v35  ;;  %v1649_v38 = vpop.f32.mrb[71].mxu1 }
 0x40a   :  { %v1720_v40 = vadd.f32 %v1649_v38, %v4398_v18  ;;  %3067 = vmatprep.mubr.msk.f32.mxu0 %vm655_vm3, %v1755_v15 }
 0x40b   :  { %3068 = vmatmul.mubr.msk.f32.gmra.mrb[68].mxu0 %vm655_vm3, %v1756_v8  ;;  %v1758_v10 = vadd.f32 %v3915_v49, %v1721_v37 }
 0x40c   :  { %v1757_v21 = vadd.f32 %v3915_v49, %v1720_v40  ;;  %v3019_v55 = vpop.f32.mrb[72].mxu1 }
 0x40d   :  { %v1723_v43 = vadd.f32 %v3019_v55, %v4399_v41  ;;  %v1659_v44 = vpop.f32.mrb[73].mxu1 }
 0x40e   :  { %v1722_v47 = vadd.f32 %v1659_v44, %v4400_v33  ;;  %3070 = vmatprep.mubr.msk.f32.mxu0 %vm655_vm3, %v1757_v21 }
 0x40f   :  { %3071 = vmatmul.mubr.msk.f32.gmra.mrb[70].mxu0 %vm655_vm3, %v1758_v10  ;;  %v1760_v19 = vadd.f32 %v3915_v49, %v1723_v43 }
 0x410   :  { %v1759_v39 = vadd.f32 %v3915_v49, %v1722_v47  ;;  %v3022_v17 = vpop.f32.mrb[74].mxu1 }
 0x411   :  { %v1725_v50 = vadd.f32 %v3022_v17, %v4401_v48  ;;  %v1669_v51 = vpop.f32.mrb[75].mxu1 }
 0x412   :  { %v1724_v53 = vadd.f32 %v1669_v51, %v4402_v52  ;;  %3073 = vmatprep.mubr.msk.f32.mxu0 %vm655_vm3, %v1759_v39 }
 0x413   :  { %3074 = vmatmul.mubr.msk.f32.gmra.mrb[72].mxu0 %vm655_vm3, %v1760_v19  ;;  %v1762_v2 = vadd.f32 %v3915_v49, %v1725_v50 }
 0x414   :  { %v1761_v58 = vadd.f32 %v3915_v49, %v1724_v53  ;;  %v3025_v23 = vpop.f32.mrb[76].mxu1 }
 0x415   :  { %v1727_v56 = vadd.f32 %v3025_v23, %v4403_v54  ;;  %v1679_v57 = vpop.f32.mrb[77].mxu1 }
 0x416   :  { %v1726_v59 = vadd.f32 %v1679_v57, %v4404_v5  ;;  %3076 = vmatprep.mubr.msk.f32.mxu0 %vm655_vm3, %v1761_v58 }
 0x417   :  { %3077 = vmatmul.mubr.msk.f32.gmra.mrb[74].mxu0 %vm655_vm3, %v1762_v2  ;;  %v1764_v60 = vadd.f32 %v3915_v49, %v1727_v56 }
 0x418   :  { %v1763_v11 = vadd.f32 %v3915_v49, %v1726_v59  ;;  %v3028_v42 = vpop.f32.mrb[78].mxu1 }
 0x419   :  { %v1729_v61 = vadd.f32 %v3028_v42, %v4405_v31  ;;  %v1689_v62 = vpop.f32.mrb[79].mxu1 }
 0x41a   :  { %v1728_v0 = vadd.f32 %v1689_v62, %v4406_v26  ;;  %3079 = vmatprep.mubr.msk.f32.mxu0 %vm655_vm3, %v1763_v11 }
 0x41b   :  { %3080 = vmatmul.mubr.msk.f32.gmra.mrb[76].mxu0 %vm655_vm3, %v1764_v60  ;;  %v1766_v20 = vadd.f32 %v3915_v49, %v1729_v61 }
 0x41c   :  { %v1765_v45 = vadd.f32 %v3915_v49, %v1728_v0 }
 0x41e   :  { %3082 = vmatprep.mubr.msk.f32.mxu0 %vm655_vm3, %v1765_v45 }
 0x41f   :  { %3083 = vmatmul.mubr.msk.f32.gmra.mrb[78].mxu0 %vm655_vm3, %v1766_v20 }
 0x4b6   :  { %v3039_v29 = vpop.f32.mrb[48].mxu0 }
 0x4b7   :  { %v1946_v36 = vadd.f32 %v3039_v29, %v4046_v46  ;;  %v1940_v1 = vpop.f32.mrb[49].mxu0 }
 0x4b8   :  { %v1941_v6 = vadd.f32 %v4046_v46, %v1940_v1 }
 0x4b9   :  { %v2603_v3 = vpack.c.bf16 %v1946_v36, %v1946_v36 }
 0x4ba   :  { %v2602_v4 = vpack.c.bf16 %v1941_v6, %v1941_v6  ;;  %v3042_v22 = vpop.f32.mrb[50].mxu0 }
 0x4bb   :  { %2229 = vst.msk [vmem:[%s4375_s7 + $0x4] sm:$0xf] %vm2227_vm4, %v2603_v3  ;;  %v1956_v49 = vadd.f32 %v3042_v22, %v4046_v46  ;;  %2262 = vrot.lane.b32.xlu1 %v2603_v3, %s3122_s13  ;;  %v1950_v27 = vpop.f32.mrb[51].mxu0 }
 0x4bc   :  { %2228 = vst.msk [vmem:[%s4375_s7] sm:$0xf] %vm2227_vm4, %v2602_v4  ;;  %v1951_v24 = vadd.f32 %v4046_v46, %v1950_v27  ;;  %2260 = vrot.lane.b32.xlu0 %v2602_v4, %s3122_s13 }
 0x4bd   :  { %v2605_v25 = vpack.c.bf16 %v1956_v49, %v1956_v49 }
 0x4be   :  { %v2604_v7 = vpack.c.bf16 %v1951_v24, %v1951_v24  ;;  %v3045_v12 = vpop.f32.mrb[52].mxu0 }
 0x4bf   :  { %2231 = vst.msk [vmem:[%s4375_s7 + $0xc] sm:$0xf] %vm2227_vm4, %v2605_v25  ;;  %v1966_v9 = vadd.f32 %v3045_v12, %v4046_v46  ;;  %2266 = vrot.lane.b32.xlu1 %v2605_v25, %s3122_s13  ;;  %v1960_v16 = vpop.f32.mrb[53].mxu0 }
 0x4c0   :  { %2230 = vst.msk [vmem:[%s4375_s7 + $0x8] sm:$0xf] %vm2227_vm4, %v2604_v7  ;;  %v1961_v63 = vadd.f32 %v4046_v46, %v1960_v16  ;;  %2264 = vrot.lane.b32.xlu0 %v2604_v7, %s3122_s13 }
 0x4c1   :  { %v2607_v28 = vpack.c.bf16 %v1966_v9, %v1966_v9 }
 0x4c2   :  { %v2606_v30 = vpack.c.bf16 %v1961_v63, %v1961_v63  ;;  %v3048_v32 = vpop.f32.mrb[54].mxu0 }
 0x4c3   :  { %2233 = vst.msk [vmem:[%s4375_s7 + $0x14] sm:$0xf] %vm2227_vm4, %v2607_v28  ;;  %v1976_v13 = vadd.f32 %v3048_v32, %v4046_v46  ;;  %2270 = vrot.lane.b32.xlu1 %v2607_v28, %s3122_s13  ;;  %v1970_v34 = vpop.f32.mrb[55].mxu0 }
 0x4c4   :  { %2232 = vst.msk [vmem:[%s4375_s7 + $0x10] sm:$0xf] %vm2227_vm4, %v2606_v30  ;;  %v1971_v15 = vadd.f32 %v4046_v46, %v1970_v34  ;;  %2268 = vrot.lane.b32.xlu0 %v2606_v30, %s3122_s13 }
 0x4c5   :  { %v2609_v14 = vpack.c.bf16 %v1976_v13, %v1976_v13 }
 0x4c6   :  { %v2608_v8 = vpack.c.bf16 %v1971_v15, %v1971_v15  ;;  %v3051_v35 = vpop.f32.mrb[56].mxu0 }
 0x4c7   :  { %2235 = vst.msk [vmem:[%s4375_s7 + $0x1c] sm:$0xf] %vm2227_vm4, %v2609_v14  ;;  %v1986_v37 = vadd.f32 %v3051_v35, %v4046_v46  ;;  %2274 = vrot.lane.b32.xlu1 %v2609_v14, %s3122_s13  ;;  %v1980_v38 = vpop.f32.mrb[57].mxu0 }
 0x4c8   :  { %2234 = vst.msk [vmem:[%s4375_s7 + $0x18] sm:$0xf] %vm2227_vm4, %v2608_v8  ;;  %v1981_v18 = vadd.f32 %v4046_v46, %v1980_v38  ;;  %2272 = vrot.lane.b32.xlu0 %v2608_v8, %s3122_s13 }
 0x4c9   :  { %v2611_v40 = vpack.c.bf16 %v1986_v37, %v1986_v37 }
 0x4ca   :  { %v2610_v21 = vpack.c.bf16 %v1981_v18, %v1981_v18  ;;  %v3054_v55 = vpop.f32.mrb[58].mxu0 }
 0x4cb   :  { %2237 = vst.msk [vmem:[%s4375_s7 + $0x24] sm:$0xf] %vm2227_vm4, %v2611_v40  ;;  %v1996_v10 = vadd.f32 %v3054_v55, %v4046_v46  ;;  %2278 = vrot.lane.b32.xlu1 %v2611_v40, %s3122_s13  ;;  %v1990_v41 = vpop.f32.mrb[59].mxu0 }
 0x4cc   :  { %2236 = vst.msk [vmem:[%s4375_s7 + $0x20] sm:$0xf] %vm2227_vm4, %v2610_v21  ;;  %v1991_v43 = vadd.f32 %v4046_v46, %v1990_v41  ;;  %2276 = vrot.lane.b32.xlu0 %v2610_v21, %s3122_s13 }
 0x4cd   :  { %v2613_v44 = vpack.c.bf16 %v1996_v10, %v1996_v10 }
 0x4ce   :  { %v2612_v33 = vpack.c.bf16 %v1991_v43, %v1991_v43  ;;  %v3057_v47 = vpop.f32.mrb[60].mxu0 }
 0x4cf   :  { %2239 = vst.msk [vmem:[%s4375_s7 + $0x2c] sm:$0xf] %vm2227_vm4, %v2613_v44  ;;  %v2006_v39 = vadd.f32 %v3057_v47, %v4046_v46  ;;  %2282 = vrot.lane.b32.xlu1 %v2613_v44, %s3122_s13  ;;  %v2000_v17 = vpop.f32.mrb[61].mxu0 }
 0x4d0   :  { %2238 = vst.msk [vmem:[%s4375_s7 + $0x28] sm:$0xf] %vm2227_vm4, %v2612_v33  ;;  %v2001_v19 = vadd.f32 %v4046_v46, %v2000_v17  ;;  %2280 = vrot.lane.b32.xlu0 %v2612_v33, %s3122_s13 }
 0x4d1   :  { %v2615_v48 = vpack.c.bf16 %v2006_v39, %v2006_v39 }
 0x4d2   :  { %v2614_v50 = vpack.c.bf16 %v2001_v19, %v2001_v19  ;;  %v3060_v51 = vpop.f32.mrb[62].mxu0 }
 0x4d3   :  { %2241 = vst.msk [vmem:[%s4375_s7 + $0x34] sm:$0xf] %vm2227_vm4, %v2615_v48  ;;  %v2016_v52 = vadd.f32 %v3060_v51, %v4046_v46  ;;  %2286 = vrot.lane.b32.xlu1 %v2615_v48, %s3122_s13  ;;  %v2010_v53 = vpop.f32.mrb[63].mxu0 }
 0x4d4   :  { %2240 = vst.msk [vmem:[%s4375_s7 + $0x30] sm:$0xf] %vm2227_vm4, %v2614_v50  ;;  %v2011_v58 = vadd.f32 %v4046_v46, %v2010_v53  ;;  %2284 = vrot.lane.b32.xlu0 %v2614_v50, %s3122_s13 }
 0x4d5   :  { %v2617_v23 = vpack.c.bf16 %v2016_v52, %v2016_v52 }
 0x4d6   :  { %v2616_v2 = vpack.c.bf16 %v2011_v58, %v2011_v58  ;;  %v3063_v54 = vpop.f32.mrb[64].mxu0 }
 0x4d7   :  { %2243 = vst.msk [vmem:[%s4375_s7 + $0x3c] sm:$0xf] %vm2227_vm4, %v2617_v23  ;;  %v2026_v56 = vadd.f32 %v3063_v54, %v4046_v46  ;;  %2290 = vrot.lane.b32.xlu1 %v2617_v23, %s3122_s13  ;;  %v2020_v57 = vpop.f32.mrb[65].mxu0 }
 0x4d8   :  { %2242 = vst.msk [vmem:[%s4375_s7 + $0x38] sm:$0xf] %vm2227_vm4, %v2616_v2  ;;  %v2021_v5 = vadd.f32 %v4046_v46, %v2020_v57  ;;  %2288 = vrot.lane.b32.xlu0 %v2616_v2, %s3122_s13 }
 0x4d9   :  { %v2619_v59 = vpack.c.bf16 %v2026_v56, %v2026_v56 }
 0x4da   :  { %v2618_v11 = vpack.c.bf16 %v2021_v5, %v2021_v5  ;;  %v3066_v42 = vpop.f32.mrb[66].mxu0 }
 0x4db   :  { %2245 = vst.msk [vmem:[%s4375_s7 + $0x44] sm:$0xf] %vm2227_vm4, %v2619_v59  ;;  %v2036_v60 = vadd.f32 %v3066_v42, %v4046_v46  ;;  %2294 = vrot.lane.b32.xlu1 %v2619_v59, %s3122_s13  ;;  %v2030_v31 = vpop.f32.mrb[67].mxu0 }
 0x4dc   :  { %2244 = vst.msk [vmem:[%s4375_s7 + $0x40] sm:$0xf] %vm2227_vm4, %v2618_v11  ;;  %v2031_v61 = vadd.f32 %v4046_v46, %v2030_v31  ;;  %2292 = vrot.lane.b32.xlu0 %v2618_v11, %s3122_s13 }
 0x4dd   :  { %v2621_v62 = vpack.c.bf16 %v2036_v60, %v2036_v60 }
 0x4de   :  { %v2620_v26 = vpack.c.bf16 %v2031_v61, %v2031_v61  ;;  %v3069_v0 = vpop.f32.mrb[68].mxu0 }
 0x4df   :  { %2247 = vst.msk [vmem:[%s4375_s7 + $0x4c] sm:$0xf] %vm2227_vm4, %v2621_v62  ;;  %v2046_v45 = vadd.f32 %v3069_v0, %v4046_v46  ;;  %2298 = vrot.lane.b32.xlu1 %v2621_v62, %s3122_s13  ;;  %v2040_v20 = vpop.f32.mrb[69].mxu0 }
 0x4e0   :  { %2246 = vst.msk [vmem:[%s4375_s7 + $0x48] sm:$0xf] %vm2227_vm4, %v2620_v26  ;;  %v2041_v29 = vadd.f32 %v4046_v46, %v2040_v20  ;;  %2296 = vrot.lane.b32.xlu0 %v2620_v26, %s3122_s13 }
 0x4e1   :  { %v2623_v36 = vpack.c.bf16 %v2046_v45, %v2046_v45 }
 0x4e2   :  { %v2622_v1 = vpack.c.bf16 %v2041_v29, %v2041_v29  ;;  %v3072_v6 = vpop.f32.mrb[70].mxu0 }
 0x4e3   :  { %2249 = vst.msk [vmem:[%s4375_s7 + $0x54] sm:$0xf] %vm2227_vm4, %v2623_v36  ;;  %v2056_v3 = vadd.f32 %v3072_v6, %v4046_v46  ;;  %2302 = vrot.lane.b32.xlu1 %v2623_v36, %s3122_s13  ;;  %v2050_v4 = vpop.f32.mrb[71].mxu0 }
 0x4e4   :  { %2248 = vst.msk [vmem:[%s4375_s7 + $0x50] sm:$0xf] %vm2227_vm4, %v2622_v1  ;;  %v2051_v22 = vadd.f32 %v4046_v46, %v2050_v4  ;;  %2300 = vrot.lane.b32.xlu0 %v2622_v1, %s3122_s13 }
 0x4e5   :  { %v2625_v49 = vpack.c.bf16 %v2056_v3, %v2056_v3 }
 0x4e6   :  { %v2624_v27 = vpack.c.bf16 %v2051_v22, %v2051_v22  ;;  %v3075_v24 = vpop.f32.mrb[72].mxu0 }
 0x4e7   :  { %2251 = vst.msk [vmem:[%s4375_s7 + $0x5c] sm:$0xf] %vm2227_vm4, %v2625_v49  ;;  %v2066_v25 = vadd.f32 %v3075_v24, %v4046_v46  ;;  %2306 = vrot.lane.b32.xlu1 %v2625_v49, %s3122_s13  ;;  %v2060_v7 = vpop.f32.mrb[73].mxu0 }
 0x4e8   :  { %2250 = vst.msk [vmem:[%s4375_s7 + $0x58] sm:$0xf] %vm2227_vm4, %v2624_v27  ;;  %v2061_v12 = vadd.f32 %v4046_v46, %v2060_v7  ;;  %2304 = vrot.lane.b32.xlu0 %v2624_v27, %s3122_s13 }
 0x4e9   :  { %v2627_v9 = vpack.c.bf16 %v2066_v25, %v2066_v25 }
 0x4ea   :  { %v2626_v16 = vpack.c.bf16 %v2061_v12, %v2061_v12  ;;  %v3078_v63 = vpop.f32.mrb[74].mxu0 }
 0x4eb   :  { %2253 = vst.msk [vmem:[%s4375_s7 + $0x64] sm:$0xf] %vm2227_vm4, %v2627_v9  ;;  %v2076_v28 = vadd.f32 %v3078_v63, %v4046_v46  ;;  %2310 = vrot.lane.b32.xlu1 %v2627_v9, %s3122_s13  ;;  %v2070_v30 = vpop.f32.mrb[75].mxu0 }
 0x4ec   :  { %2252 = vst.msk [vmem:[%s4375_s7 + $0x60] sm:$0xf] %vm2227_vm4, %v2626_v16  ;;  %v2071_v32 = vadd.f32 %v4046_v46, %v2070_v30  ;;  %2308 = vrot.lane.b32.xlu0 %v2626_v16, %s3122_s13 }
 0x4ed   :  { %v2629_v13 = vpack.c.bf16 %v2076_v28, %v2076_v28 }
 0x4ee   :  { %v2628_v34 = vpack.c.bf16 %v2071_v32, %v2071_v32  ;;  %v3081_v15 = vpop.f32.mrb[76].mxu0 }
 0x4ef   :  { %2255 = vst.msk [vmem:[%s4375_s7 + $0x6c] sm:$0xf] %vm2227_vm4, %v2629_v13  ;;  %v2086_v14 = vadd.f32 %v3081_v15, %v4046_v46  ;;  %2314 = vrot.lane.b32.xlu1 %v2629_v13, %s3122_s13  ;;  %v2080_v8 = vpop.f32.mrb[77].mxu0 }
 0x4f0   :  { %2254 = vst.msk [vmem:[%s4375_s7 + $0x68] sm:$0xf] %vm2227_vm4, %v2628_v34  ;;  %v2081_v35 = vadd.f32 %v4046_v46, %v2080_v8  ;;  %2312 = vrot.lane.b32.xlu0 %v2628_v34, %s3122_s13 }
 0x4f1   :  { %v2631_v37 = vpack.c.bf16 %v2086_v14, %v2086_v14 }
 0x4f2   :  { %v2630_v38 = vpack.c.bf16 %v2081_v35, %v2081_v35  ;;  %v3084_v18 = vpop.f32.mrb[78].mxu0 }
 0x4f3   :  { %2257 = vst.msk [vmem:[%s4375_s7 + $0x74] sm:$0xf] %vm2227_vm4, %v2631_v37  ;;  %v2096_v40 = vadd.f32 %v3084_v18, %v4046_v46  ;;  %2318 = vrot.lane.b32.xlu1 %v2631_v37, %s3122_s13  ;;  %v2090_v21 = vpop.f32.mrb[79].mxu0 }
 0x4f4   :  { %2256 = vst.msk [vmem:[%s4375_s7 + $0x70] sm:$0xf] %vm2227_vm4, %v2630_v38  ;;  %v2091_v55 = vadd.f32 %v4046_v46, %v2090_v21  ;;  %2316 = vrot.lane.b32.xlu0 %v2630_v38, %s3122_s13 }
 0x4f5   :  { %v2633_v10 = vpack.c.bf16 %v2096_v40, %v2096_v40 }
 0x4f6   :  { %v2632_v41 = vpack.c.bf16 %v2091_v55, %v2091_v55 }
 0x4f7   :  { %2259 = vst.msk [vmem:[%s4375_s7 + $0x7c] sm:$0xf] %vm2227_vm4, %v2633_v10  ;;  %2322 = vrot.lane.b32.xlu1 %v2633_v10, %s3122_s13 }
 0x4f8   :  { %2258 = vst.msk [vmem:[%s4375_s7 + $0x78] sm:$0xf] %vm2227_vm4, %v2632_v41  ;;  %2320 = vrot.lane.b32.xlu0 %v2632_v41, %s3122_s13 }
 0x52d   :  { %v2263_v46 = vpop.permute.xlu1 %2262 }
 0x52e   :  { %2358 = vst.msk [vmem:[%s4376_s8 + $0x4] sm:$0xf] %vm2356_vm5, %v2263_v46  ;;  %v2261_v43 = vpop.permute.xlu0 %2260 }
 0x52f   :  { %2357 = vst.msk [vmem:[%s4376_s8] sm:$0xf] %vm2356_vm5, %v2261_v43 }
 0x531   :  { %v2267_v44 = vpop.permute.xlu1 %2266 }
 0x532   :  { %2360 = vst.msk [vmem:[%s4376_s8 + $0xc] sm:$0xf] %vm2356_vm5, %v2267_v44  ;;  %v2265_v33 = vpop.permute.xlu0 %2264 }
 0x533   :  { %2359 = vst.msk [vmem:[%s4376_s8 + $0x8] sm:$0xf] %vm2356_vm5, %v2265_v33 }
 0x535   :  { %v2271_v47 = vpop.permute.xlu1 %2270 }
 0x536   :  { %2362 = vst.msk [vmem:[%s4376_s8 + $0x14] sm:$0xf] %vm2356_vm5, %v2271_v47  ;;  %v2269_v39 = vpop.permute.xlu0 %2268 }
 0x537   :  { %2361 = vst.msk [vmem:[%s4376_s8 + $0x10] sm:$0xf] %vm2356_vm5, %v2269_v39 }
 0x539   :  { %v2275_v17 = vpop.permute.xlu1 %2274 }
 0x53a   :  { %2364 = vst.msk [vmem:[%s4376_s8 + $0x1c] sm:$0xf] %vm2356_vm5, %v2275_v17  ;;  %v2273_v19 = vpop.permute.xlu0 %2272 }
 0x53b   :  { %2363 = vst.msk [vmem:[%s4376_s8 + $0x18] sm:$0xf] %vm2356_vm5, %v2273_v19 }
 0x53d   :  { %v2279_v48 = vpop.permute.xlu1 %2278 }
 0x53e   :  { %2366 = vst.msk [vmem:[%s4376_s8 + $0x24] sm:$0xf] %vm2356_vm5, %v2279_v48  ;;  %v2277_v50 = vpop.permute.xlu0 %2276 }
 0x53f   :  { %2365 = vst.msk [vmem:[%s4376_s8 + $0x20] sm:$0xf] %vm2356_vm5, %v2277_v50 }
 0x541   :  { %v2283_v51 = vpop.permute.xlu1 %2282 }
 0x542   :  { %2368 = vst.msk [vmem:[%s4376_s8 + $0x2c] sm:$0xf] %vm2356_vm5, %v2283_v51  ;;  %v2281_v52 = vpop.permute.xlu0 %2280 }
 0x543   :  { %2367 = vst.msk [vmem:[%s4376_s8 + $0x28] sm:$0xf] %vm2356_vm5, %v2281_v52 }
 0x545   :  { %v2287_v53 = vpop.permute.xlu1 %2286 }
 0x546   :  { %2370 = vst.msk [vmem:[%s4376_s8 + $0x34] sm:$0xf] %vm2356_vm5, %v2287_v53  ;;  %v2285_v58 = vpop.permute.xlu0 %2284 }
 0x547   :  { %2369 = vst.msk [vmem:[%s4376_s8 + $0x30] sm:$0xf] %vm2356_vm5, %v2285_v58 }
 0x549   :  { %v2291_v23 = vpop.permute.xlu1 %2290 }
 0x54a   :  { %2372 = vst.msk [vmem:[%s4376_s8 + $0x3c] sm:$0xf] %vm2356_vm5, %v2291_v23  ;;  %v2289_v2 = vpop.permute.xlu0 %2288 }
 0x54b   :  { %2371 = vst.msk [vmem:[%s4376_s8 + $0x38] sm:$0xf] %vm2356_vm5, %v2289_v2 }
 0x54d   :  { %v2295_v54 = vpop.permute.xlu1 %2294 }
 0x54e   :  { %2374 = vst.msk [vmem:[%s4376_s8 + $0x44] sm:$0xf] %vm2356_vm5, %v2295_v54  ;;  %v2293_v56 = vpop.permute.xlu0 %2292 }
 0x54f   :  { %2373 = vst.msk [vmem:[%s4376_s8 + $0x40] sm:$0xf] %vm2356_vm5, %v2293_v56 }
 0x551   :  { %v2299_v57 = vpop.permute.xlu1 %2298 }
 0x552   :  { %2376 = vst.msk [vmem:[%s4376_s8 + $0x4c] sm:$0xf] %vm2356_vm5, %v2299_v57  ;;  %v2297_v5 = vpop.permute.xlu0 %2296 }
 0x553   :  { %2375 = vst.msk [vmem:[%s4376_s8 + $0x48] sm:$0xf] %vm2356_vm5, %v2297_v5 }
 0x555   :  { %v2303_v59 = vpop.permute.xlu1 %2302 }
 0x556   :  { %2378 = vst.msk [vmem:[%s4376_s8 + $0x54] sm:$0xf] %vm2356_vm5, %v2303_v59  ;;  %v2301_v11 = vpop.permute.xlu0 %2300 }
 0x557   :  { %2377 = vst.msk [vmem:[%s4376_s8 + $0x50] sm:$0xf] %vm2356_vm5, %v2301_v11 }
 0x559   :  { %v2307_v42 = vpop.permute.xlu1 %2306 }
 0x55a   :  { %2380 = vst.msk [vmem:[%s4376_s8 + $0x5c] sm:$0xf] %vm2356_vm5, %v2307_v42  ;;  %v2305_v60 = vpop.permute.xlu0 %2304 }
 0x55b   :  { %2379 = vst.msk [vmem:[%s4376_s8 + $0x58] sm:$0xf] %vm2356_vm5, %v2305_v60 }
 0x55d   :  { %v2311_v31 = vpop.permute.xlu1 %2310 }
 0x55e   :  { %2382 = vst.msk [vmem:[%s4376_s8 + $0x64] sm:$0xf] %vm2356_vm5, %v2311_v31  ;;  %v2309_v61 = vpop.permute.xlu0 %2308 }
 0x55f   :  { %2381 = vst.msk [vmem:[%s4376_s8 + $0x60] sm:$0xf] %vm2356_vm5, %v2309_v61 }
 0x561   :  { %v2315_v62 = vpop.permute.xlu1 %2314 }
 0x562   :  { %2384 = vst.msk [vmem:[%s4376_s8 + $0x6c] sm:$0xf] %vm2356_vm5, %v2315_v62  ;;  %v2313_v26 = vpop.permute.xlu0 %2312 }
 0x563   :  { %2383 = vst.msk [vmem:[%s4376_s8 + $0x68] sm:$0xf] %vm2356_vm5, %v2313_v26 }
 0x565   :  { %v2319_v0 = vpop.permute.xlu1 %2318 }
 0x566   :  { %2386 = vst.msk [vmem:[%s4376_s8 + $0x74] sm:$0xf] %vm2356_vm5, %v2319_v0  ;;  %v2317_v45 = vpop.permute.xlu0 %2316 }
 0x567   :  { %2385 = vst.msk [vmem:[%s4376_s8 + $0x70] sm:$0xf] %vm2356_vm5, %v2317_v45 }
 0x569   :  { %v2323_v20 = vpop.permute.xlu1 %2322 }
 0x56a   :  { %2388 = vst.msk [vmem:[%s4376_s8 + $0x7c] sm:$0xf] %vm2356_vm5, %v2323_v20  ;;  %v2321_v29 = vpop.permute.xlu0 %2320 }
 0x56b   :  { %2387 = vst.msk [vmem:[%s4376_s8 + $0x78] sm:$0xf] %vm2356_vm5, %v2321_v29 }

</bundles_post_ra>
